<compile_context>
chip_gen: v5e
topology: v5e:2x2
jax: 0.10.0
libtpu: 0.0.40
codegen_flags: <defaults>
</compile_context>

<pallas_src>
import functools

import jax
import jax.numpy as jnp
from jax import lax
from jax.experimental import pallas as pl
from jax.experimental.pallas import tpu as pltpu


# ----------------------------------------------------------------------------
# Kernel 1: Y = act(X @ W + b)  — conv1 / conv2 as im2col matmuls (whole batch).
# ----------------------------------------------------------------------------
def matmul_bias_act_kernel(x_ref, w_ref, b_ref, o_ref, *, relu):
    y = jnp.dot(x_ref[...], w_ref[...], preferred_element_type=jnp.float32)
    y = y + b_ref[...]
    if relu:
        y = jnp.maximum(y, 0.0)
    o_ref[...] = y.astype(o_ref.dtype)


def _matmul_bias_act(x, w, b, relu):
    m, n = x.shape[0], w.shape[1]
    vmem = pl.BlockSpec(memory_space=pltpu.MemorySpace.VMEM)
    return pl.pallas_call(
        functools.partial(matmul_bias_act_kernel, relu=relu),
        out_shape=jax.ShapeDtypeStruct((m, n), jnp.float32),
        in_specs=[vmem, vmem, vmem],
        out_specs=vmem,
    )(x, w, b)


# ----------------------------------------------------------------------------
# Kernel 2: fused conv3 (matmul) + SpatialSoftmax + lin1 + ReLU + lin2.
# Grid over batch; each step consumes (HW, K3) patches and emits (1, state_dim).
# ----------------------------------------------------------------------------
def ss_head_kernel(p_ref, w3_ref, b3_ref, pos_ref,
                   w1x_ref, w1y_ref, b1_ref, w2_ref, b2_ref, o_ref):
    # conv3 (no activation in the PyTorch module) as an im2col matmul.
    g = jnp.dot(p_ref[0], w3_ref[...], preferred_element_type=jnp.float32)
    g = g + b3_ref[...]                                    # (HW, C), C on lanes

    # SpatialSoftmax: per-channel softmax over the HW spatial rows.
    m = jnp.max(g, axis=0, keepdims=True)                  # (1, C)
    e = jnp.exp(g - m)                                     # (HW, C)
    s = jnp.sum(e, axis=0, keepdims=True)                  # (1, C)
    inv = 1.0 / s
    # Expected keypoint coordinates (division by the partition folded in after
    # the pos contraction, so no (HW, C)-sized divide).
    ex = jnp.dot(pos_ref[0:1, :], e, preferred_element_type=jnp.float32) * inv  # (1, C)
    ey = jnp.dot(pos_ref[1:2, :], e, preferred_element_type=jnp.float32) * inv  # (1, C)

    # lin1 on the interleaved [x_c, y_c] features, expressed as two matmuls
    # against the even/odd rows of W1 (split in the wrapper) -> no transpose.
    h = (jnp.dot(ex, w1x_ref[...], preferred_element_type=jnp.float32)
         + jnp.dot(ey, w1y_ref[...], preferred_element_type=jnp.float32)
         + b1_ref[...])                                    # (1, 512)
    h = jnp.maximum(h, 0.0)

    # lin2
    out = jnp.dot(h, w2_ref[...], preferred_element_type=jnp.float32) + b2_ref[...]
    o_ref[0] = out                                         # (1, state_dim)


def _ss_head(patches3, pos, w3, b3, w1x, w1y, b1, w2, b2):
    n, hw, k3 = patches3.shape
    c = w3.shape[1]
    h1 = w1x.shape[1]
    s = w2.shape[1]
    out = pl.pallas_call(
        ss_head_kernel,
        out_shape=jax.ShapeDtypeStruct((n, 1, s), jnp.float32),
        grid=(n,),
        in_specs=[
            pl.BlockSpec((1, hw, k3), lambda i: (i, 0, 0)),
            pl.BlockSpec((k3, c), lambda i: (0, 0)),
            pl.BlockSpec((1, c), lambda i: (0, 0)),
            pl.BlockSpec((2, hw), lambda i: (0, 0)),
            pl.BlockSpec((c, h1), lambda i: (0, 0)),
            pl.BlockSpec((c, h1), lambda i: (0, 0)),
            pl.BlockSpec((1, h1), lambda i: (0, 0)),
            pl.BlockSpec((h1, s), lambda i: (0, 0)),
            pl.BlockSpec((1, s), lambda i: (0, 0)),
        ],
        out_specs=pl.BlockSpec((1, 1, s), lambda i: (i, 0, 0)),
        compiler_params=pltpu.CompilerParams(dimension_semantics=("parallel",)),
    )(patches3, w3, b3, pos, w1x, w1y, b1, w2, b2)
    return out.reshape(n, s)


# ----------------------------------------------------------------------------
# JAX glue: padding / im2col / coordinate grid (layout plumbing, not compute).
# ----------------------------------------------------------------------------
def _im2col(x, kh, kw, stride, pad):
    """x: (N, H, W, C) NHWC -> (N, Ho*Wo, kh*kw*C), plus (Ho, Wo)."""
    if pad:
        x = jnp.pad(x, ((0, 0), (pad, pad), (pad, pad), (0, 0)))
    n, hp, wp, c = x.shape
    ho = (hp - kh) // stride + 1
    wo = (wp - kw) // stride + 1
    cols = []
    for i in range(kh):
        for j in range(kw):
            cols.append(x[:, i:i + stride * (ho - 1) + 1:stride,
                          j:j + stride * (wo - 1) + 1:stride, :])
    patches = jnp.stack(cols, axis=-2)                     # (N, Ho, Wo, kh*kw, C)
    return patches.reshape(n, ho * wo, kh * kw * c), ho, wo


def _pos_grid(h, w):
    ys = jnp.linspace(-1.0, 1.0, h)
    xs = jnp.linspace(-1.0, 1.0, w)
    pos_y = jnp.repeat(ys, w)          # varies with row index
    pos_x = jnp.tile(xs, h)            # varies with column index
    return jnp.stack([pos_x, pos_y], axis=0).astype(jnp.float32)   # (2, HW)


def perception_forward(params, visual_obv, dof_obv=None):
    """visual_obv: (N, 3, H, W) NCHW like PyTorch; dof_obv: (N, dof_dim)."""
    x = jnp.transpose(visual_obv, (0, 2, 3, 1)).astype(jnp.float32)   # NHWC
    n = x.shape[0]

    # conv1 + ReLU
    p1, h1, w1 = _im2col(x, 8, 8, 4, 2)
    y1 = _matmul_bias_act(p1.reshape(n * h1 * w1, -1), params["w1"], params["b1"], True)
    y1 = y1.reshape(n, h1, w1, 32)

    # conv2 + ReLU
    p2, h2, w2 = _im2col(y1, 4, 4, 2, 0)
    y2 = _matmul_bias_act(p2.reshape(n * h2 * w2, -1), params["w2"], params["b2"], True)
    y2 = y2.reshape(n, h2, w2, 64)

    # conv3 + SpatialSoftmax + lin1 + ReLU + lin2, fused in one kernel.
    p3, h3, w3 = _im2col(y2, 3, 3, 1, 0)                   # (N, HW, 576)
    pos = _pos_grid(h3, w3)                                # (2, HW)
    w1x = params["wl1"][0::2]                              # rows multiplying x-keypoints
    w1y = params["wl1"][1::2]                              # rows multiplying y-keypoints
    state = _ss_head(p3, pos, params["w3"], params["b3"],
                     w1x, w1y, params["bl1"], params["wl2"], params["bl2"])

    if dof_obv is not None:
        state = jnp.concatenate([state, dof_obv.astype(state.dtype)], axis=-1)
    return state


# ----------------------------------------------------------------------------
# Deterministic parameter init (PyTorch-like uniform(-1/sqrt(fan_in), +)).
# Conv weights are stored (kh*kw*Cin, Cout) to match the im2col column order.
# ----------------------------------------------------------------------------
def init_params(key, state_dim=64):
    def u(k, shape, fan_in):
        bound = 1.0 / jnp.sqrt(float(fan_in))
        return jax.random.uniform(k, shape, jnp.float32, -bound, bound)

    ks = jax.random.split(key, 10)
    return {
        "w1": u(ks[0], (8 * 8 * 3, 32), 8 * 8 * 3),
        "b1": u(ks[1], (1, 32), 8 * 8 * 3),
        "w2": u(ks[2], (4 * 4 * 32, 64), 4 * 4 * 32),
        "b2": u(ks[3], (1, 64), 4 * 4 * 32),
        "w3": u(ks[4], (3 * 3 * 64, 64), 3 * 3 * 64),
        "b3": u(ks[5], (1, 64), 3 * 3 * 64),
        "wl1": u(ks[6], (128, 512), 128),
        "bl1": u(ks[7], (1, 512), 128),
        "wl2": u(ks[8], (512, state_dim), 512),
        "bl2": u(ks[9], (1, state_dim), 512),
    }


# ----------------------------------------------------------------------------
# Pure-JAX reference (XLA conv + explicit interleaved keypoints) for checking.
# ----------------------------------------------------------------------------
def reference_forward(params, visual_obv, dof_obv=None):
    x = jnp.transpose(visual_obv, (0, 2, 3, 1)).astype(jnp.float32)

    def conv(xx, w_flat, b, kh, kw, stride, pad, cin, cout, relu):
        w = w_flat.reshape(kh, kw, cin, cout)
        y = lax.conv_general_dilated(
            xx, w, window_strides=(stride, stride),
            padding=[(pad, pad), (pad, pad)],
            dimension_numbers=("NHWC", "HWIO", "NHWC"),
            precision=lax.Precision.HIGHEST)
        y = y + b.reshape(1, 1, 1, cout)
        return jnp.maximum(y, 0.0) if relu else y

    y = conv(x, params["w1"], params["b1"], 8, 8, 4, 2, 3, 32, True)
    y = conv(y, params["w2"], params["b2"], 4, 4, 2, 0, 32, 64, True)
    y = conv(y, params["w3"], params["b3"], 3, 3, 1, 0, 64, 64, False)

    n, h, w, c = y.shape
    feat = y.reshape(n, h * w, c)
    attn = jax.nn.softmax(feat, axis=1)                    # softmax over HW per channel
    pos = _pos_grid(h, w)
    ex = jnp.einsum("k,nkc->nc", pos[0], attn, precision=lax.Precision.HIGHEST)
    ey = jnp.einsum("k,nkc->nc", pos[1], attn, precision=lax.Precision.HIGHEST)
    kp = jnp.stack([ex, ey], axis=-1).reshape(n, 2 * c)    # interleaved [x_c, y_c]
    hdn = jnp.maximum(jnp.dot(kp, params["wl1"], precision=lax.Precision.HIGHEST)
                      + params["bl1"], 0.0)
    out = jnp.dot(hdn, params["wl2"], precision=lax.Precision.HIGHEST) + params["bl2"]
    if dof_obv is not None:
        out = jnp.concatenate([out, dof_obv.astype(out.dtype)], axis=-1)
    return out


if __name__ == "__main__":
    # Small shapes consistent with the module: batch=2, 3x64x64 images
    # (conv stack -> 16x16 -> 7x7 -> 5x5 spatial softmax grid), dof_dim=8,
    # state_dim=64.
    N, H, W = 2, 64, 64
    STATE_DIM, DOF_DIM = 64, 8

    root = jax.random.PRNGKey(0)
    k_img, k_dof, k_par = jax.random.split(root, 3)
    visual = jax.random.normal(k_img, (N, 3, H, W), jnp.float32)
    dof = jax.random.normal(k_dof, (N, DOF_DIM), jnp.float32)
    params = init_params(k_par, STATE_DIM)

    forward = jax.jit(perception_forward)
    out = forward(params, visual, dof)
    jax.block_until_ready(out)

    assert out.shape == (N, STATE_DIM + DOF_DIM), out.shape

    ref = reference_forward(params, visual, dof)
    assert jnp.allclose(out, ref, atol=5e-3, rtol=5e-3), (
        "mismatch vs reference: max abs err = "
        f"{float(jnp.max(jnp.abs(out - ref)))}")

    print("KERNEL_OK")
</pallas_src>

<mosaic_0001>
module attributes {stable_mosaic.version = 11 : i64} {
  func.func @matmul_bias_act_kernel(%arg0: memref<512x192xf32, #tpu.memory_space<vmem>>, %arg1: memref<192x32xf32, #tpu.memory_space<vmem>>, %arg2: memref<1x32xf32, #tpu.memory_space<vmem>>, %arg3: memref<512x32xf32, #tpu.memory_space<vmem>>) attributes {dimension_semantics = [], scalar_prefetch = 0 : i64, scratch_operands = 0 : i64, tpu.core_type = #tpu.core_type<tc>} {
    %c0 = arith.constant 0 : index
    %c0_0 = arith.constant 0 : index
    %0 = vector.load %arg0[%c0, %c0_0] : memref<512x192xf32, #tpu.memory_space<vmem>>, vector<512x192xf32>
    %c0_1 = arith.constant 0 : index
    %c0_2 = arith.constant 0 : index
    %1 = vector.load %arg1[%c0_1, %c0_2] : memref<192x32xf32, #tpu.memory_space<vmem>>, vector<192x32xf32>
    %cst = arith.constant dense<0.000000e+00> : vector<512x32xf32>
    %2 = tpu.matmul %0, %1, %cst {dimension_numbers = #tpu.dot_dimension_numbers<[1], [0], [0], [1], [0, 0, 1, 1], [], []>} : vector<512x192xf32>, vector<192x32xf32>, vector<512x32xf32> -> vector<512x32xf32>
    %c0_3 = arith.constant 0 : index
    %c0_4 = arith.constant 0 : index
    %3 = vector.load %arg2[%c0_3, %c0_4] : memref<1x32xf32, #tpu.memory_space<vmem>>, vector<1x32xf32>
    %4 = vector.broadcast %3 : vector<1x32xf32> to vector<512x32xf32>
    %5 = arith.addf %2, %4 : vector<512x32xf32>
    %cst_5 = arith.constant 0.000000e+00 : f32
    %6 = vector.broadcast %cst_5 : f32 to vector<512x32xf32>
    %7 = arith.maximumf %5, %6 : vector<512x32xf32>
    %c0_6 = arith.constant 0 : index
    %c0_7 = arith.constant 0 : index
    %8 = vector.load %arg3[%c0_6, %c0_7] : memref<512x32xf32, #tpu.memory_space<vmem>>, vector<512x32xf32>
    tpu.vector_store %arg3[%c0_6, %c0_7], %7 {strides = array<i32>} : memref<512x32xf32, #tpu.memory_space<vmem>>, vector<512x32xf32>,
    return
  }
}

module attributes {stable_mosaic.version = 11 : i64} {
  func.func @matmul_bias_act_kernel(%arg0: memref<98x512xf32, #tpu.memory_space<vmem>>, %arg1: memref<512x64xf32, #tpu.memory_space<vmem>>, %arg2: memref<1x64xf32, #tpu.memory_space<vmem>>, %arg3: memref<98x64xf32, #tpu.memory_space<vmem>>) attributes {dimension_semantics = [], scalar_prefetch = 0 : i64, scratch_operands = 0 : i64, tpu.core_type = #tpu.core_type<tc>} {
    %c0 = arith.constant 0 : index
    %c0_0 = arith.constant 0 : index
    %0 = vector.load %arg0[%c0, %c0_0] : memref<98x512xf32, #tpu.memory_space<vmem>>, vector<98x512xf32>
    %c0_1 = arith.constant 0 : index
    %c0_2 = arith.constant 0 : index
    %1 = vector.load %arg1[%c0_1, %c0_2] : memref<512x64xf32, #tpu.memory_space<vmem>>, vector<512x64xf32>
    %cst = arith.constant dense<0.000000e+00> : vector<98x64xf32>
    %2 = tpu.matmul %0, %1, %cst {dimension_numbers = #tpu.dot_dimension_numbers<[1], [0], [0], [1], [0, 0, 1, 1], [], []>} : vector<98x512xf32>, vector<512x64xf32>, vector<98x64xf32> -> vector<98x64xf32>
    %c0_3 = arith.constant 0 : index
    %c0_4 = arith.constant 0 : index
    %3 = vector.load %arg2[%c0_3, %c0_4] : memref<1x64xf32, #tpu.memory_space<vmem>>, vector<1x64xf32>
    %4 = vector.broadcast %3 : vector<1x64xf32> to vector<98x64xf32>
    %5 = arith.addf %2, %4 : vector<98x64xf32>
    %cst_5 = arith.constant 0.000000e+00 : f32
    %6 = vector.broadcast %cst_5 : f32 to vector<98x64xf32>
    %7 = arith.maximumf %5, %6 : vector<98x64xf32>
    %c0_6 = arith.constant 0 : index
    %c0_7 = arith.constant 0 : index
    %8 = vector.load %arg3[%c0_6, %c0_7] : memref<98x64xf32, #tpu.memory_space<vmem>>, vector<98x64xf32>
    tpu.vector_store %arg3[%c0_6, %c0_7], %7 {strides = array<i32>} : memref<98x64xf32, #tpu.memory_space<vmem>>, vector<98x64xf32>,
    return
  }
}

module attributes {stable_mosaic.version = 11 : i64} {
  func.func @ss_head_kernel(%arg0: i32, %arg1: memref<1x25x576xf32, #tpu.memory_space<vmem>>, %arg2: memref<576x64xf32, #tpu.memory_space<vmem>>, %arg3: memref<1x64xf32, #tpu.memory_space<vmem>>, %arg4: memref<2x25xf32, #tpu.memory_space<vmem>>, %arg5: memref<64x512xf32, #tpu.memory_space<vmem>>, %arg6: memref<64x512xf32, #tpu.memory_space<vmem>>, %arg7: memref<1x512xf32, #tpu.memory_space<vmem>>, %arg8: memref<512x64xf32, #tpu.memory_space<vmem>>, %arg9: memref<1x64xf32, #tpu.memory_space<vmem>>, %arg10: memref<1x1x64xf32, #tpu.memory_space<vmem>>) attributes {dimension_semantics = [#tpu.dimension_semantics<parallel>], iteration_bounds = array<i64: 2>, scalar_prefetch = 0 : i64, scratch_operands = 0 : i64, tpu.core_type = #tpu.core_type<tc>, window_params = [{transform_indices = @transform_0, window_bounds = array<i64: 1, 25, 576>}, {pipeline_mode = #tpu.pipeline_mode<synchronous>, transform_indices = @transform_1, window_bounds = array<i64: 576, 64>}, {pipeline_mode = #tpu.pipeline_mode<synchronous>, transform_indices = @transform_2, window_bounds = array<i64: 1, 64>}, {pipeline_mode = #tpu.pipeline_mode<synchronous>, transform_indices = @transform_3, window_bounds = array<i64: 2, 25>}, {pipeline_mode = #tpu.pipeline_mode<synchronous>, transform_indices = @transform_4, window_bounds = array<i64: 64, 512>}, {pipeline_mode = #tpu.pipeline_mode<synchronous>, transform_indices = @transform_5, window_bounds = array<i64: 64, 512>}, {pipeline_mode = #tpu.pipeline_mode<synchronous>, transform_indices = @transform_6, window_bounds = array<i64: 1, 512>}, {pipeline_mode = #tpu.pipeline_mode<synchronous>, transform_indices = @transform_7, window_bounds = array<i64: 512, 64>}, {pipeline_mode = #tpu.pipeline_mode<synchronous>, transform_indices = @transform_8, window_bounds = array<i64: 1, 64>}, {transform_indices = @transform_9, window_bounds = array<i64: 1, 1, 64>}]} {
    %c0 = arith.constant 0 : index
    %c0_0 = arith.constant 0 : index
    %c0_1 = arith.constant 0 : index
    %0 = vector.load %arg1[%c0, %c0_0, %c0_1] : memref<1x25x576xf32, #tpu.memory_space<vmem>>, vector<1x25x576xf32>
    %1 = vector.shape_cast %0 : vector<1x25x576xf32> to vector<25x576xf32>
    %c0_2 = arith.constant 0 : index
    %c0_3 = arith.constant 0 : index
    %2 = vector.load %arg2[%c0_2, %c0_3] : memref<576x64xf32, #tpu.memory_space<vmem>>, vector<576x64xf32>
    %cst = arith.constant dense<0.000000e+00> : vector<25x64xf32>
    %3 = tpu.matmul %1, %2, %cst {dimension_numbers = #tpu.dot_dimension_numbers<[1], [0], [0], [1], [0, 0, 1, 1], [], []>} : vector<25x576xf32>, vector<576x64xf32>, vector<25x64xf32> -> vector<25x64xf32>
    %c0_4 = arith.constant 0 : index
    %c0_5 = arith.constant 0 : index
    %4 = vector.load %arg3[%c0_4, %c0_5] : memref<1x64xf32, #tpu.memory_space<vmem>>, vector<1x64xf32>
    %5 = vector.broadcast %4 : vector<1x64xf32> to vector<25x64xf32>
    %6 = arith.addf %3, %5 : vector<25x64xf32>
    %cst_6 = arith.constant dense<0xFF800000> : vector<64xf32>
    %7 = vector.multi_reduction <maximumf>, %6, %cst_6 [0] : vector<25x64xf32> to vector<64xf32>
    %8 = vector.shape_cast %7 : vector<64xf32> to vector<1x64xf32>
    %9 = vector.broadcast %8 : vector<1x64xf32> to vector<25x64xf32>
    %10 = arith.subf %6, %9 : vector<25x64xf32>
    %11 = math.exp %10 : vector<25x64xf32>
    %cst_7 = arith.constant dense<0.000000e+00> : vector<64xf32>
    %12 = vector.multi_reduction <add>, %11, %cst_7 [0] : vector<25x64xf32> to vector<64xf32>
    %13 = vector.shape_cast %12 : vector<64xf32> to vector<1x64xf32>
    %cst_8 = arith.constant 1.000000e+00 : f32
    %14 = vector.broadcast %cst_8 : f32 to vector<1x64xf32>
    %15 = arith.divf %14, %13 : vector<1x64xf32>
    %c0_9 = arith.constant 0 : index
    %c0_10 = arith.constant 0 : index
    %16 = vector.load %arg4[%c0_9, %c0_10] : memref<2x25xf32, #tpu.memory_space<vmem>>, vector<1x25xf32>
    %cst_11 = arith.constant dense<0.000000e+00> : vector<1x64xf32>
    %17 = tpu.matmul %16, %11, %cst_11 {dimension_numbers = #tpu.dot_dimension_numbers<[1], [0], [0], [1], [0, 0, 1, 1], [], []>} : vector<1x25xf32>, vector<25x64xf32>, vector<1x64xf32> -> vector<1x64xf32>
    %18 = arith.mulf %17, %15 : vector<1x64xf32>
    %c1 = arith.constant 1 : index
    %c0_12 = arith.constant 0 : index
    %19 = vector.load %arg4[%c1, %c0_12] : memref<2x25xf32, #tpu.memory_space<vmem>>, vector<1x25xf32>
    %cst_13 = arith.constant dense<0.000000e+00> : vector<1x64xf32>
    %20 = tpu.matmul %19, %11, %cst_13 {dimension_numbers = #tpu.dot_dimension_numbers<[1], [0], [0], [1], [0, 0, 1, 1], [], []>} : vector<1x25xf32>, vector<25x64xf32>, vector<1x64xf32> -> vector<1x64xf32>
    %21 = arith.mulf %20, %15 : vector<1x64xf32>
    %c0_14 = arith.constant 0 : index
    %c0_15 = arith.constant 0 : index
    %22 = vector.load %arg5[%c0_14, %c0_15] : memref<64x512xf32, #tpu.memory_space<vmem>>, vector<64x512xf32>
    %cst_16 = arith.constant dense<0.000000e+00> : vector<1x512xf32>
    %23 = tpu.matmul %18, %22, %cst_16 {dimension_numbers = #tpu.dot_dimension_numbers<[1], [0], [0], [1], [0, 0, 1, 1], [], []>} : vector<1x64xf32>, vector<64x512xf32>, vector<1x512xf32> -> vector<1x512xf32>
    %c0_17 = arith.constant 0 : index
    %c0_18 = arith.constant 0 : index
    %24 = vector.load %arg6[%c0_17, %c0_18] : memref<64x512xf32, #tpu.memory_space<vmem>>, vector<64x512xf32>
    %cst_19 = arith.constant dense<0.000000e+00> : vector<1x512xf32>
    %25 = tpu.matmul %21, %24, %cst_19 {dimension_numbers = #tpu.dot_dimension_numbers<[1], [0], [0], [1], [0, 0, 1, 1], [], []>} : vector<1x64xf32>, vector<64x512xf32>, vector<1x512xf32> -> vector<1x512xf32>
    %26 = arith.addf %23, %25 : vector<1x512xf32>
    %c0_20 = arith.constant 0 : index
    %c0_21 = arith.constant 0 : index
    %27 = vector.load %arg7[%c0_20, %c0_21] : memref<1x512xf32, #tpu.memory_space<vmem>>, vector<1x512xf32>
    %28 = arith.addf %26, %27 : vector<1x512xf32>
    %cst_22 = arith.constant 0.000000e+00 : f32
    %29 = vector.broadcast %cst_22 : f32 to vector<1x512xf32>
    %30 = arith.maximumf %28, %29 : vector<1x512xf32>
    %c0_23 = arith.constant 0 : index
    %c0_24 = arith.constant 0 : index
    %31 = vector.load %arg8[%c0_23, %c0_24] : memref<512x64xf32, #tpu.memory_space<vmem>>, vector<512x64xf32>
    %cst_25 = arith.constant dense<0.000000e+00> : vector<1x64xf32>
    %32 = tpu.matmul %30, %31, %cst_25 {dimension_numbers = #tpu.dot_dimension_numbers<[1], [0], [0], [1], [0, 0, 1, 1], [], []>} : vector<1x512xf32>, vector<512x64xf32>, vector<1x64xf32> -> vector<1x64xf32>
    %c0_26 = arith.constant 0 : index
    %c0_27 = arith.constant 0 : index
    %33 = vector.load %arg9[%c0_26, %c0_27] : memref<1x64xf32, #tpu.memory_space<vmem>>, vector<1x64xf32>
    %34 = arith.addf %32, %33 : vector<1x64xf32>
    %c0_28 = arith.constant 0 : index
    %c0_29 = arith.constant 0 : index
    %c0_30 = arith.constant 0 : index
    %35 = vector.load %arg10[%c0_28, %c0_29, %c0_30] : memref<1x1x64xf32, #tpu.memory_space<vmem>>, vector<1x1x64xf32>
    %36 = vector.shape_cast %35 : vector<1x1x64xf32> to vector<1x64xf32>
    %37 = vector.shape_cast %34 : vector<1x64xf32> to vector<1x1x64xf32>
    tpu.vector_store %arg10[%c0_28, %c0_29, %c0_30], %37 {strides = array<i32>} : memref<1x1x64xf32, #tpu.memory_space<vmem>>, vector<1x1x64xf32>,
    return
  }
  func.func @transform_0(%arg0: i32) -> (i32, i32, i32) {
    %c0_i32 = arith.constant 0 : i32
    %c0_i32_0 = arith.constant 0 : i32
    %c0_i32_1 = arith.constant 0 : i32
    return %arg0, %c0_i32, %c0_i32_0 : i32, i32, i32
  }
  func.func @transform_1(%arg0: i32) -> (i32, i32) {
    %c0_i32 = arith.constant 0 : i32
    %c0_i32_0 = arith.constant 0 : i32
    %c0_i32_1 = arith.constant 0 : i32
    return %c0_i32, %c0_i32_0 : i32, i32
  }
  func.func @transform_2(%arg0: i32) -> (i32, i32) {
    %c0_i32 = arith.constant 0 : i32
    %c0_i32_0 = arith.constant 0 : i32
    %c0_i32_1 = arith.constant 0 : i32
    return %c0_i32, %c0_i32_0 : i32, i32
  }
  func.func @transform_3(%arg0: i32) -> (i32, i32) {
    %c0_i32 = arith.constant 0 : i32
    %c0_i32_0 = arith.constant 0 : i32
    %c0_i32_1 = arith.constant 0 : i32
    return %c0_i32, %c0_i32_0 : i32, i32
  }
  func.func @transform_4(%arg0: i32) -> (i32, i32) {
    %c0_i32 = arith.constant 0 : i32
    %c0_i32_0 = arith.constant 0 : i32
    %c0_i32_1 = arith.constant 0 : i32
    return %c0_i32, %c0_i32_0 : i32, i32
  }
  func.func @transform_5(%arg0: i32) -> (i32, i32) {
    %c0_i32 = arith.constant 0 : i32
    %c0_i32_0 = arith.constant 0 : i32
    %c0_i32_1 = arith.constant 0 : i32
    return %c0_i32, %c0_i32_0 : i32, i32
  }
  func.func @transform_6(%arg0: i32) -> (i32, i32) {
    %c0_i32 = arith.constant 0 : i32
    %c0_i32_0 = arith.constant 0 : i32
    %c0_i32_1 = arith.constant 0 : i32
    return %c0_i32, %c0_i32_0 : i32, i32
  }
  func.func @transform_7(%arg0: i32) -> (i32, i32) {
    %c0_i32 = arith.constant 0 : i32
    %c0_i32_0 = arith.constant 0 : i32
    %c0_i32_1 = arith.constant 0 : i32
    return %c0_i32, %c0_i32_0 : i32, i32
  }
  func.func @transform_8(%arg0: i32) -> (i32, i32) {
    %c0_i32 = arith.constant 0 : i32
    %c0_i32_0 = arith.constant 0 : i32
    %c0_i32_1 = arith.constant 0 : i32
    return %c0_i32, %c0_i32_0 : i32, i32
  }
  func.func @transform_9(%arg0: i32) -> (i32, i32, i32) {
    %c0_i32 = arith.constant 0 : i32
    %c0_i32_0 = arith.constant 0 : i32
    %c0_i32_1 = arith.constant 0 : i32
    return %arg0, %c0_i32, %c0_i32_0 : i32, i32, i32
  }
}

</mosaic_0001>

<bundles_post_ra>
// kernel: perception_forward.3
= control target key start
LH: loop header
LB: loop body
LE: loop exit
PB: predicated region body
PF: predicated region fallthrough
CT: control target
= control target key end

     0   :  { %vm170_vm0 = vcmask 523264   ;;  %vm845_vm1 = vcmask 261120   ;;  %s1919_s1 = inlined_call_operand.vmem [shape: f32[192,32], index: 1, kind: input, shape index: {}]   ;;  %s1920_s0 = inlined_call_operand.vmem [shape: f32[512,192], index: 0, kind: input, shape index: {}]   ;;  %s1921_s2 = inlined_call_operand.vmem [shape: f32[1,32], index: 2, kind: input, shape index: {}]   ;;  %s1922_s3 = inlined_call_operand.vmem [shape: f32[512,32], index: 3, kind: output, shape index: {}]  }
   0x1   :  { %v157_v0 = vld [vmem:[%s1919_s1 + $0x78] sm:$0xff]  ;;  %v156_v2 = vld [vmem:[%s1919_s1 + $0x70] sm:$0xff]  ;;  %v155_v4 = vld [vmem:[%s1919_s1 + $0x68] sm:$0xff] }
   0x2   :  { %v165_v1 = vld [vmem:[%s1919_s1 + $0xb8] sm:$0xff]  ;;  %978 = vmatpush.msra.mxu2 %v157_v0  ;;  %v164_v3 = vld [vmem:[%s1919_s1 + $0xb0] sm:$0xff]  ;;  %v163_v5 = vld [vmem:[%s1919_s1 + $0xa8] sm:$0xff]  ;;  %363 = vmatpush.msra.mxu0 %v157_v0 }
   0x3   :  { %580 = vmatpush.msra.mxu1 %v165_v1  ;;  %994 = vmatpush.msra.mxu3 %v165_v1  ;;  %v154_v6 = vld [vmem:[%s1919_s1 + $0x60] sm:$0xff]  ;;  %v153_v8 = vld [vmem:[%s1919_s1 + $0x58] sm:$0xff]  ;;  %v152_v10 = vld [vmem:[%s1919_s1 + $0x50] sm:$0xff] }
   0x4   :  { %979 = vmatpush.msra.mxu2 %v156_v2  ;;  %v162_v7 = vld [vmem:[%s1919_s1 + $0xa0] sm:$0xff]  ;;  %364 = vmatpush.msra.mxu0 %v156_v2  ;;  %v161_v9 = vld [vmem:[%s1919_s1 + $0x98] sm:$0xff]  ;;  %v160_v11 = vld [vmem:[%s1919_s1 + $0x90] sm:$0xff] }
   0x5   :  { %581 = vmatpush.msra.mxu1 %v164_v3  ;;  %995 = vmatpush.msra.mxu3 %v164_v3  ;;  %v151_v12 = vld [vmem:[%s1919_s1 + $0x48] sm:$0xff]  ;;  %v150_v14 = vld [vmem:[%s1919_s1 + $0x40] sm:$0xff]  ;;  %v149_v17 = vld [vmem:[%s1919_s1 + $0x38] sm:$0xff] }
   0x6   :  { %980 = vmatpush.msra.mxu2 %v155_v4  ;;  %365 = vmatpush.msra.mxu0 %v155_v4  ;;  %v159_v13 = vld [vmem:[%s1919_s1 + $0x88] sm:$0xff]  ;;  %v158_v15 = vld [vmem:[%s1919_s1 + $0x80] sm:$0xff]  ;;  %v148_v18 = vld [vmem:[%s1919_s1 + $0x30] sm:$0xff] }
   0x7   :  { %582 = vmatpush.msra.mxu1 %v163_v5  ;;  %996 = vmatpush.msra.mxu3 %v163_v5  ;;  %v15_v16 = vld [vmem:[%s1920_s0 + $0x8] sm:$0xff]  ;;  %v81_v19 = vld [vmem:[%s1920_s0 + $0x218] sm:$0xff]  ;;  %v146_v21 = vld [vmem:[%s1919_s1 + $0x20] sm:$0xff] }
   0x8   :  { %981 = vmatpush.msra.mxu2 %v154_v6  ;;  %366 = vmatpush.msra.mxu0 %v154_v6  ;;  %v147_v20 = vld [vmem:[%s1919_s1 + $0x28] sm:$0xff]  ;;  %v17_v22 = vld [vmem:[%s1920_s0 + $0x18] sm:$0xff]  ;;  %v144_v24 = vld [vmem:[%s1919_s1 + $0x10] sm:$0xff] }
   0x9   :  { %583 = vmatpush.msra.mxu1 %v162_v7  ;;  %997 = vmatpush.msra.mxu3 %v162_v7  ;;  %v145_v23 = vld [vmem:[%s1919_s1 + $0x18] sm:$0xff]  ;;  %v83_v25 = vld [vmem:[%s1920_s0 + $0x228] sm:$0xff]  ;;  %v142_v27 = vld [vmem:[%s1919_s1] sm:$0xff] }
   0xa   :  { %982 = vmatpush.msra.mxu2 %v153_v8  ;;  %367 = vmatpush.msra.mxu0 %v153_v8  ;;  %v143_v26 = vld [vmem:[%s1919_s1 + $0x8] sm:$0xff]  ;;  %v76_v28 = vld [vmem:[%s1920_s0 + $0x1f0] sm:$0xff]  ;;  %v14_v30 = vld [vmem:[%s1920_s0] sm:$0xff] }
   0xb   :  { %584 = vmatpush.msra.mxu1 %v161_v9  ;;  %998 = vmatpush.msra.mxu3 %v161_v9  ;;  %v19_v29 = vld [vmem:[%s1920_s0 + $0x28] sm:$0xff]  ;;  %v85_v31 = vld [vmem:[%s1920_s0 + $0x238] sm:$0xff]  ;;  %v78_v32 = vld [vmem:[%s1920_s0 + $0x200] sm:$0xff] }
   0xc   :  { %983 = vmatpush.msra.mxu2 %v152_v10  ;;  %368 = vmatpush.msra.mxu0 %v152_v10  ;;  %v21_v33 = vld [vmem:[%s1920_s0 + $0x38] sm:$0xff]  ;;  %v16_v34 = vld [vmem:[%s1920_s0 + $0x10] sm:$0xff]  ;;  %v87_v35 = vld [vmem:[%s1920_s0 + $0x248] sm:$0xff] }
   0xd   :  { %585 = vmatpush.msra.mxu1 %v160_v11  ;;  %999 = vmatpush.msra.mxu3 %v160_v11  ;;  %v80_v36 = vld [vmem:[%s1920_s0 + $0x210] sm:$0xff]  ;;  %v23_v37 = vld [vmem:[%s1920_s0 + $0x48] sm:$0xff]  ;;  %v18_v38 = vld [vmem:[%s1920_s0 + $0x20] sm:$0xff] }
   0xe   :  { %984 = vmatpush.msra.mxu2 %v151_v12  ;;  %369 = vmatpush.msra.mxu0 %v151_v12  ;;  %v89_v39 = vld [vmem:[%s1920_s0 + $0x258] sm:$0xff]  ;;  %v82_v40 = vld [vmem:[%s1920_s0 + $0x220] sm:$0xff]  ;;  %v20_v42 = vld [vmem:[%s1920_s0 + $0x30] sm:$0xff] }
   0xf   :  { %586 = vmatpush.msra.mxu1 %v159_v13  ;;  %1000 = vmatpush.msra.mxu3 %v159_v13  ;;  %v25_v41 = vld [vmem:[%s1920_s0 + $0x58] sm:$0xff]  ;;  %v91_v43 = vld [vmem:[%s1920_s0 + $0x268] sm:$0xff]  ;;  %v84_v44 = vld [vmem:[%s1920_s0 + $0x230] sm:$0xff] }
  0x10   :  { %985 = vmatpush.msra.mxu2 %v150_v14  ;;  %370 = vmatpush.msra.mxu0 %v150_v14  ;;  %v27_v45 = vld [vmem:[%s1920_s0 + $0x68] sm:$0xff]  ;;  %v22_v46 = vld [vmem:[%s1920_s0 + $0x40] sm:$0xff]  ;;  %v93_v47 = vld [vmem:[%s1920_s0 + $0x278] sm:$0xff] }
  0x11   :  { %587 = vmatpush.msra.mxu1 %v158_v15  ;;  %1001 = vmatpush.msra.mxu3 %v158_v15  ;;  %v86_v48 = vld [vmem:[%s1920_s0 + $0x240] sm:$0xff]  ;;  %v29_v49 = vld [vmem:[%s1920_s0 + $0x78] sm:$0xff]  ;;  %v24_v50 = vld [vmem:[%s1920_s0 + $0x50] sm:$0xff] }
  0x12   :  { %914 = vmatmul.msk.f32.vlgmr.msra.gmra.mxu1 %vm170_vm0, %v15_v16  ;;  %986 = vmatpush.msra.mxu2 %v149_v17  ;;  %v95_v51 = vld [vmem:[%s1920_s0 + $0x288] sm:$0xff]  ;;  %v88_v52 = vld [vmem:[%s1920_s0 + $0x250] sm:$0xff]  ;;  %v26_v54 = vld [vmem:[%s1920_s0 + $0x60] sm:$0xff] }
  0x13   :  { %371 = vmatpush.msra.mxu0 %v149_v17  ;;  %947 = vmatmul.msk.f32.vlgmr.msra.gmra.mxu3 %vm170_vm0, %v81_v19  ;;  %v31_v53 = vld [vmem:[%s1920_s0 + $0x88] sm:$0xff]  ;;  %v97_v55 = vld [vmem:[%s1920_s0 + $0x298] sm:$0xff]  ;;  %v90_v56 = vld [vmem:[%s1920_s0 + $0x260] sm:$0xff] }
  0x14   :  { %987 = vmatpush.msra.mxu2 %v148_v18  ;;  %v33_v57 = vld [vmem:[%s1920_s0 + $0x98] sm:$0xff]  ;;  %v28_v58 = vld [vmem:[%s1920_s0 + $0x70] sm:$0xff]  ;;  %v99_v59 = vld [vmem:[%s1920_s0 + $0x2a8] sm:$0xff] }
  0x15   :  { %372 = vmatpush.msra.mxu0 %v148_v18  ;;  %v92_v60 = vld [vmem:[%s1920_s0 + $0x270] sm:$0xff]  ;;  %v35_v61 = vld [vmem:[%s1920_s0 + $0xa8] sm:$0xff]  ;;  %v30_v62 = vld [vmem:[%s1920_s0 + $0x80] sm:$0xff] }
  0x16   :  { %988 = vmatpush.msra.mxu2 %v147_v20  ;;  %v101_v63 = vld [vmem:[%s1920_s0 + $0x2b8] sm:$0xff]  ;;  %v94_v0 = vld [vmem:[%s1920_s0 + $0x280] sm:$0xff]  ;;  %v32_v2 = vld [vmem:[%s1920_s0 + $0x90] sm:$0xff] }
  0x17   :  { %373 = vmatpush.msra.mxu0 %v147_v20  ;;  %v37_v1 = vld [vmem:[%s1920_s0 + $0xb8] sm:$0xff]  ;;  %v103_v3 = vld [vmem:[%s1920_s0 + $0x2c8] sm:$0xff]  ;;  %v96_v4 = vld [vmem:[%s1920_s0 + $0x290] sm:$0xff] }
  0x18   :  { %989 = vmatpush.msra.mxu2 %v146_v21  ;;  %v39_v5 = vld [vmem:[%s1920_s0 + $0xc8] sm:$0xff]  ;;  %v34_v6 = vld [vmem:[%s1920_s0 + $0xa0] sm:$0xff]  ;;  %v105_v7 = vld [vmem:[%s1920_s0 + $0x2d8] sm:$0xff] }
  0x19   :  { %374 = vmatpush.msra.mxu0 %v146_v21  ;;  %v98_v8 = vld [vmem:[%s1920_s0 + $0x2a0] sm:$0xff]  ;;  %v41_v9 = vld [vmem:[%s1920_s0 + $0xd8] sm:$0xff]  ;;  %v36_v10 = vld [vmem:[%s1920_s0 + $0xb0] sm:$0xff] }
  0x1a   :  { %915 = vmatmul.msk.f32.gmra.mxu1 %vm170_vm0, %v17_v22  ;;  %990 = vmatpush.msra.mxu2 %v145_v23  ;;  %v107_v11 = vld [vmem:[%s1920_s0 + $0x2e8] sm:$0xff]  ;;  %v100_v12 = vld [vmem:[%s1920_s0 + $0x2b0] sm:$0xff]  ;;  %v38_v14 = vld [vmem:[%s1920_s0 + $0xc0] sm:$0xff] }
  0x1b   :  { %375 = vmatpush.msra.mxu0 %v145_v23  ;;  %948 = vmatmul.msk.f32.gmra.mxu3 %vm170_vm0, %v83_v25  ;;  %v43_v13 = vld [vmem:[%s1920_s0 + $0xe8] sm:$0xff]  ;;  %v109_v15 = vld [vmem:[%s1920_s0 + $0x2f8] sm:$0xff]  ;;  %v102_v16 = vld [vmem:[%s1920_s0 + $0x2c0] sm:$0xff] }
  0x1c   :  { %991 = vmatpush.msra.mxu2 %v144_v24  ;;  %v45_v17 = vld [vmem:[%s1920_s0 + $0xf8] sm:$0xff]  ;;  %v40_v18 = vld [vmem:[%s1920_s0 + $0xd0] sm:$0xff]  ;;  %v111_v19 = vld [vmem:[%s1920_s0 + $0x308] sm:$0xff] }
  0x1d   :  { %376 = vmatpush.msra.mxu0 %v144_v24  ;;  %v104_v21 = vld [vmem:[%s1920_s0 + $0x2d0] sm:$0xff]  ;;  %v47_v22 = vld [vmem:[%s1920_s0 + $0x108] sm:$0xff]  ;;  %v42_v23 = vld [vmem:[%s1920_s0 + $0xe0] sm:$0xff] }
  0x1e   :  { %992 = vmatpush.msra.mxu2 %v143_v26  ;;  %v113_v24 = vld [vmem:[%s1920_s0 + $0x318] sm:$0xff] }
  0x1f   :  { %377 = vmatpush.msra.mxu0 %v143_v26  ;;  %v106_v26 = vld [vmem:[%s1920_s0 + $0x2e0] sm:$0xff] }
  0x20   :  { %993 = vmatpush.msra.mxu2 %v142_v27 }
  0x21   :  { %472 = vmatmul.f32.vlgmr.msra.gmra.mxu2 %v76_v28  ;;  %378 = vmatpush.msra.mxu0 %v142_v27  ;;  %v49_v27 = vld [vmem:[%s1920_s0 + $0x118] sm:$0xff] }
  0x22   :  { %916 = vmatmul.msk.f32.gmra.mxu1 %vm170_vm0, %v19_v29  ;;  %379 = vmatmul.f32.vlgmr.msra.gmra.mxu0 %v14_v30  ;;  %v44_v29 = vld [vmem:[%s1920_s0 + $0xf0] sm:$0xff]  ;;  %v115_v30 = vld [vmem:[%s1920_s0 + $0x328] sm:$0xff] }
  0x23   :  { %949 = vmatmul.msk.f32.gmra.mxu3 %vm170_vm0, %v85_v31  ;;  %v1340_v31 = vld [vmem:[%s1921_s2] ss:$0 sm:$0xff] }
  0x29   :  { %475 = vmatmul.f32.gmra.mxu2 %v78_v32 }
  0x2a   :  { %917 = vmatmul.msk.f32.gmra.mxu1 %vm170_vm0, %v21_v33  ;;  %382 = vmatmul.f32.gmra.mxu0 %v16_v34  ;;  %v108_v33 = vld [vmem:[%s1920_s0 + $0x2f0] sm:$0xff]  ;;  %v51_v34 = vld [vmem:[%s1920_s0 + $0x128] sm:$0xff] }
  0x2b   :  { %950 = vmatmul.msk.f32.gmra.mxu3 %vm170_vm0, %v87_v35 }
  0x31   :  { %478 = vmatmul.f32.gmra.mxu2 %v80_v36 }
  0x32   :  { %918 = vmatmul.msk.f32.gmra.mxu1 %vm170_vm0, %v23_v37  ;;  %385 = vmatmul.f32.gmra.mxu0 %v18_v38  ;;  %v46_v37 = vld [vmem:[%s1920_s0 + $0x100] sm:$0xff] }
  0x33   :  { %951 = vmatmul.msk.f32.gmra.mxu3 %vm170_vm0, %v89_v39  ;;  %v117_v39 = vld [vmem:[%s1920_s0 + $0x338] sm:$0xff] }
  0x39   :  { %481 = vmatmul.f32.gmra.mxu2 %v82_v40 }
  0x3a   :  { %919 = vmatmul.msk.f32.gmra.mxu1 %vm170_vm0, %v25_v41  ;;  %388 = vmatmul.f32.gmra.mxu0 %v20_v42 }
  0x3b   :  { %952 = vmatmul.msk.f32.gmra.mxu3 %vm170_vm0, %v91_v43 }
  0x41   :  { %484 = vmatmul.f32.gmra.mxu2 %v84_v44  ;;  %v110_v44 = vld [vmem:[%s1920_s0 + $0x300] sm:$0xff] }
  0x42   :  { %920 = vmatmul.msk.f32.gmra.mxu1 %vm170_vm0, %v27_v45  ;;  %391 = vmatmul.f32.gmra.mxu0 %v22_v46  ;;  %v53_v45 = vld [vmem:[%s1920_s0 + $0x138] sm:$0xff] }
  0x43   :  { %953 = vmatmul.msk.f32.gmra.mxu3 %vm170_vm0, %v93_v47 }
  0x49   :  { %487 = vmatmul.f32.gmra.mxu2 %v86_v48  ;;  %v48_v48 = vld [vmem:[%s1920_s0 + $0x110] sm:$0xff] }
  0x4a   :  { %921 = vmatmul.msk.f32.gmra.mxu1 %vm170_vm0, %v29_v49  ;;  %394 = vmatmul.f32.gmra.mxu0 %v24_v50  ;;  %v119_v50 = vld [vmem:[%s1920_s0 + $0x348] sm:$0xff] }
  0x4b   :  { %954 = vmatmul.msk.f32.gmra.mxu3 %vm170_vm0, %v95_v51 }
  0x51   :  { %490 = vmatmul.f32.gmra.mxu2 %v88_v52 }
  0x52   :  { %922 = vmatmul.msk.f32.gmra.mxu1 %vm170_vm0, %v31_v53  ;;  %397 = vmatmul.f32.gmra.mxu0 %v26_v54 }
  0x53   :  { %955 = vmatmul.msk.f32.gmra.mxu3 %vm170_vm0, %v97_v55  ;;  %v112_v55 = vld [vmem:[%s1920_s0 + $0x310] sm:$0xff] }
  0x59   :  { %493 = vmatmul.f32.gmra.mxu2 %v90_v56  ;;  %v55_v56 = vld [vmem:[%s1920_s0 + $0x148] sm:$0xff] }
  0x5a   :  { %923 = vmatmul.msk.f32.gmra.mxu1 %vm170_vm0, %v33_v57  ;;  %400 = vmatmul.f32.gmra.mxu0 %v28_v58 }
  0x5b   :  { %956 = vmatmul.msk.f32.gmra.mxu3 %vm170_vm0, %v99_v59  ;;  %v50_v59 = vld [vmem:[%s1920_s0 + $0x120] sm:$0xff] }
  0x61   :  { %496 = vmatmul.f32.gmra.mxu2 %v92_v60 }
  0x62   :  { %924 = vmatmul.msk.f32.gmra.mxu1 %vm170_vm0, %v35_v61  ;;  %403 = vmatmul.f32.gmra.mxu0 %v30_v62  ;;  %v121_v61 = vld [vmem:[%s1920_s0 + $0x358] sm:$0xff] }
  0x63   :  { %957 = vmatmul.msk.f32.gmra.mxu3 %vm170_vm0, %v101_v63 }
  0x69   :  { %499 = vmatmul.f32.gmra.mxu2 %v94_v0 }
  0x6a   :  { %925 = vmatmul.msk.f32.gmra.mxu1 %vm170_vm0, %v37_v1  ;;  %406 = vmatmul.f32.gmra.mxu0 %v32_v2 }
  0x6b   :  { %958 = vmatmul.msk.f32.gmra.mxu3 %vm170_vm0, %v103_v3  ;;  %v114_v3 = vld [vmem:[%s1920_s0 + $0x320] sm:$0xff] }
  0x71   :  { %502 = vmatmul.f32.gmra.mxu2 %v96_v4  ;;  %v57_v4 = vld [vmem:[%s1920_s0 + $0x158] sm:$0xff] }
  0x72   :  { %926 = vmatmul.msk.f32.gmra.mxu1 %vm170_vm0, %v39_v5  ;;  %409 = vmatmul.f32.gmra.mxu0 %v34_v6 }
  0x73   :  { %959 = vmatmul.msk.f32.gmra.mxu3 %vm170_vm0, %v105_v7 }
  0x79   :  { %505 = vmatmul.f32.gmra.mxu2 %v98_v8  ;;  %v52_v8 = vld [vmem:[%s1920_s0 + $0x130] sm:$0xff] }
  0x7a   :  { %927 = vmatmul.msk.f32.gmra.mxu1 %vm170_vm0, %v41_v9  ;;  %412 = vmatmul.f32.gmra.mxu0 %v36_v10 }
  0x7b   :  { %960 = vmatmul.msk.f32.gmra.mxu3 %vm170_vm0, %v107_v11  ;;  %v123_v11 = vld [vmem:[%s1920_s0 + $0x368] sm:$0xff] }
  0x81   :  { %508 = vmatmul.f32.gmra.mxu2 %v100_v12 }
  0x82   :  { %928 = vmatmul.msk.f32.gmra.mxu1 %vm170_vm0, %v43_v13  ;;  %415 = vmatmul.f32.gmra.mxu0 %v38_v14 }
  0x83   :  { %961 = vmatmul.msk.f32.gmra.mxu3 %vm170_vm0, %v109_v15 }
  0x89   :  { %511 = vmatmul.f32.gmra.mxu2 %v102_v16 }
  0x8a   :  { %929 = vmatmul.msk.f32.gmra.mxu1 %vm170_vm0, %v45_v17  ;;  %418 = vmatmul.f32.gmra.mxu0 %v40_v18  ;;  %v116_v17 = vld [vmem:[%s1920_s0 + $0x330] sm:$0xff]  ;;  %v59_v18 = vld [vmem:[%s1920_s0 + $0x168] sm:$0xff] }
  0x8b   :  { %962 = vmatmul.msk.f32.gmra.mxu3 %vm170_vm0, %v111_v19 }
  0x8f   :  { %v589_v20 = vpop.f32.mrf.mxu1 }
  0x91   :  { %514 = vmatmul.f32.gmra.mxu2 %v104_v21 }
  0x92   :  { %930 = vmatmul.msk.f32.gmra.mxu1 %vm170_vm0, %v47_v22  ;;  %421 = vmatmul.f32.gmra.mxu0 %v42_v23  ;;  %v54_v22 = vld [vmem:[%s1920_s0 + $0x140] sm:$0xff] }
  0x93   :  { %963 = vmatmul.msk.f32.gmra.mxu3 %vm170_vm0, %v113_v24 }
  0x96   :  { %v1327_v28 = vpop.f32.mrf.mxu3 }
  0x97   :  { %v592_v25 = vpop.f32.mrf.mxu1 }
  0x99   :  { %517 = vmatmul.f32.gmra.mxu2 %v106_v26 }
  0x9a   :  { %931 = vmatmul.msk.f32.gmra.mxu1 %vm170_vm0, %v49_v27  ;;  %424 = vmatmul.f32.gmra.mxu0 %v44_v29 }
  0x9b   :  { %964 = vmatmul.msk.f32.gmra.mxu3 %vm170_vm0, %v115_v30 }
  0x9e   :  { %v1348_v35 = vpop.f32.mrf.mxu3 }
  0x9f   :  { %v595_v32 = vpop.f32.mrf.mxu1  ;;  %v380_v36 = vpop.f32.mrf.mxu0 }
  0xa0   :  { %v381_v38 = vadd.f32 %v1340_v31, %v380_v36 }
  0xa1   :  { %520 = vmatmul.f32.gmra.mxu2 %v108_v33  ;;  %v61_v33 = vld [vmem:[%s1920_s0 + $0x178] sm:$0xff] }
  0xa2   :  { %932 = vmatmul.msk.f32.gmra.mxu1 %vm170_vm0, %v51_v34  ;;  %v590_v40 = vadd.f32 %v589_v20, %v381_v38  ;;  %427 = vmatmul.f32.gmra.mxu0 %v46_v37  ;;  %v56_v37 = vld [vmem:[%s1920_s0 + $0x150] sm:$0xff] }
  0xa3   :  { %965 = vmatmul.msk.f32.gmra.mxu3 %vm170_vm0, %v117_v39 }
  0xa4   :  { %v1359_v41 = vpop.f32.mrf.mxu2  ;;  %v781_v42 = vmax.f32 %v590_v40, 0.0  ;;  %v127_v40 = vld [vmem:[%s1920_s0 + $0x388] sm:$0xff] }
  0xa6   :  { %v1367_v46 = vpop.f32.mrf.mxu3  ;;  %846 = vst.msk [vmem:[%s1922_s3] sm:$0xff] %vm845_vm1, %v781_v42 }
  0xa7   :  { %v598_v43 = vpop.f32.mrf.mxu1  ;;  %v383_v47 = vpop.f32.mrf.mxu0 }
  0xa8   :  { %v384_v49 = vadd.f32 %v1340_v31, %v383_v47  ;;  %v120_v47 = vld [vmem:[%s1920_s0 + $0x350] sm:$0xff] }
  0xa9   :  { %523 = vmatmul.f32.gmra.mxu2 %v110_v44 }
  0xaa   :  { %933 = vmatmul.msk.f32.gmra.mxu1 %vm170_vm0, %v53_v45  ;;  %v593_v51 = vadd.f32 %v592_v25, %v384_v49  ;;  %430 = vmatmul.f32.gmra.mxu0 %v48_v48  ;;  %v125_v25 = vld [vmem:[%s1920_s0 + $0x378] sm:$0xff]  ;;  %v63_v48 = vld [vmem:[%s1920_s0 + $0x188] sm:$0xff] }
  0xab   :  { %966 = vmatmul.msk.f32.gmra.mxu3 %vm170_vm0, %v119_v50 }
  0xac   :  { %v1382_v52 = vpop.f32.mrf.mxu2  ;;  %v782_v53 = vmax.f32 %v593_v51, 0.0 }
  0xae   :  { %v1390_v57 = vpop.f32.mrf.mxu3  ;;  %847 = vst.msk [vmem:[%s1922_s3 + $0x8] sm:$0xff] %vm845_vm1, %v782_v53  ;;  %v58_v53 = vld [vmem:[%s1920_s0 + $0x160] sm:$0xff] }
  0xaf   :  { %v601_v54 = vpop.f32.mrf.mxu1  ;;  %v386_v58 = vpop.f32.mrf.mxu0 }
  0xb0   :  { %v387_v60 = vadd.f32 %v1340_v31, %v386_v58 }
  0xb1   :  { %526 = vmatmul.f32.gmra.mxu2 %v112_v55 }
  0xb2   :  { %934 = vmatmul.msk.f32.gmra.mxu1 %vm170_vm0, %v55_v56  ;;  %v596_v62 = vadd.f32 %v595_v32, %v387_v60  ;;  %433 = vmatmul.f32.gmra.mxu0 %v50_v59  ;;  %v118_v32 = vld [vmem:[%s1920_s0 + $0x340] sm:$0xff]  ;;  %v129_v56 = vld [vmem:[%s1920_s0 + $0x398] sm:$0xff] }
  0xb3   :  { %967 = vmatmul.msk.f32.gmra.mxu3 %vm170_vm0, %v121_v61 }
  0xb4   :  { %v479_v63 = vpop.f32.mrf.mxu2  ;;  %v783_v0 = vmax.f32 %v596_v62, 0.0  ;;  %v122_v62 = vld [vmem:[%s1920_s0 + $0x360] sm:$0xff] }
  0xb5   :  { %v480_v1 = vadd.f32 %v1340_v31, %v479_v63  ;;  %v65_v63 = vld [vmem:[%s1920_s0 + $0x198] sm:$0xff] }
  0xb6   :  { %v1412_v5 = vpop.f32.mrf.mxu3  ;;  %848 = vst.msk [vmem:[%s1922_s3 + $0x10] sm:$0xff] %vm845_vm1, %v783_v0 }
  0xb7   :  { %v604_v2 = vpop.f32.mrf.mxu1  ;;  %v689_v6 = vadd.f32 %v1327_v28, %v480_v1  ;;  %v389_v7 = vpop.f32.mrf.mxu0 }
  0xb8   :  { %v390_v10 = vadd.f32 %v1340_v31, %v389_v7  ;;  %v131_v7 = vld [vmem:[%s1920_s0 + $0x3a8] sm:$0xff] }
  0xb9   :  { %v814_v9 = vmax.f32 %v689_v6, 0.0  ;;  %529 = vmatmul.f32.gmra.mxu2 %v114_v3  ;;  %v60_v3 = vld [vmem:[%s1920_s0 + $0x170] sm:$0xff] }
  0xba   :  { %935 = vmatmul.msk.f32.gmra.mxu1 %vm170_vm0, %v57_v4  ;;  %v599_v12 = vadd.f32 %v598_v43, %v390_v10  ;;  %436 = vmatmul.f32.gmra.mxu0 %v52_v8 }
  0xbb   :  { %879 = vst.msk [vmem:[%s1922_s3 + $0x108] sm:$0xff] %vm845_vm1, %v814_v9  ;;  %968 = vmatmul.msk.f32.gmra.mxu3 %vm170_vm0, %v123_v11 }
  0xbc   :  { %v482_v13 = vpop.f32.mrf.mxu2  ;;  %v784_v14 = vmax.f32 %v599_v12, 0.0  ;;  %v124_v12 = vld [vmem:[%s1920_s0 + $0x370] sm:$0xff] }
  0xbd   :  { %v483_v15 = vadd.f32 %v1340_v31, %v482_v13  ;;  %v67_v13 = vld [vmem:[%s1920_s0 + $0x1a8] sm:$0xff] }
  0xbe   :  { %v1439_v19 = vpop.f32.mrf.mxu3  ;;  %849 = vst.msk [vmem:[%s1922_s3 + $0x18] sm:$0xff] %vm845_vm1, %v784_v14 }
  0xbf   :  { %v607_v16 = vpop.f32.mrf.mxu1  ;;  %v692_v20 = vadd.f32 %v1348_v35, %v483_v15  ;;  %v392_v21 = vpop.f32.mrf.mxu0 }
  0xc0   :  { %v393_v24 = vadd.f32 %v1340_v31, %v392_v21  ;;  %v133_v21 = vld [vmem:[%s1920_s0 + $0x3b8] sm:$0xff] }
  0xc1   :  { %v815_v23 = vmax.f32 %v692_v20, 0.0  ;;  %532 = vmatmul.f32.gmra.mxu2 %v116_v17  ;;  %v62_v17 = vld [vmem:[%s1920_s0 + $0x180] sm:$0xff] }
  0xc2   :  { %936 = vmatmul.msk.f32.gmra.mxu1 %vm170_vm0, %v59_v18  ;;  %v602_v26 = vadd.f32 %v601_v54, %v393_v24  ;;  %439 = vmatmul.f32.gmra.mxu0 %v54_v22 }
  0xc3   :  { %880 = vst.msk [vmem:[%s1922_s3 + $0x110] sm:$0xff] %vm845_vm1, %v815_v23  ;;  %969 = vmatmul.msk.f32.gmra.mxu3 %vm170_vm0, %v125_v25 }
  0xc4   :  { %v485_v27 = vpop.f32.mrf.mxu2  ;;  %v785_v28 = vmax.f32 %v602_v26, 0.0  ;;  %v126_v26 = vld [vmem:[%s1920_s0 + $0x380] sm:$0xff] }
  0xc5   :  { %v486_v29 = vadd.f32 %v1340_v31, %v485_v27  ;;  %v69_v27 = vld [vmem:[%s1920_s0 + $0x1b8] sm:$0xff] }
  0xc6   :  { %v1466_v34 = vpop.f32.mrf.mxu3  ;;  %850 = vst.msk [vmem:[%s1922_s3 + $0x20] sm:$0xff] %vm845_vm1, %v785_v28 }
  0xc7   :  { %v610_v30 = vpop.f32.mrf.mxu1  ;;  %v695_v35 = vadd.f32 %v1367_v46, %v486_v29  ;;  %v395_v36 = vpop.f32.mrf.mxu0 }
  0xc8   :  { %v396_v39 = vadd.f32 %v1340_v31, %v395_v36  ;;  %v135_v36 = vld [vmem:[%s1920_s0 + $0x3c8] sm:$0xff] }
  0xc9   :  { %v816_v38 = vmax.f32 %v695_v35, 0.0  ;;  %535 = vmatmul.f32.gmra.mxu2 %v118_v32  ;;  %v64_v32 = vld [vmem:[%s1920_s0 + $0x190] sm:$0xff] }
  0xca   :  { %937 = vmatmul.msk.f32.gmra.mxu1 %vm170_vm0, %v61_v33  ;;  %v605_v42 = vadd.f32 %v604_v2, %v396_v39  ;;  %442 = vmatmul.f32.gmra.mxu0 %v56_v37 }
  0xcb   :  { %881 = vst.msk [vmem:[%s1922_s3 + $0x118] sm:$0xff] %vm845_vm1, %v816_v38  ;;  %970 = vmatmul.msk.f32.gmra.mxu3 %vm170_vm0, %v127_v40 }
  0xcc   :  { %v488_v43 = vpop.f32.mrf.mxu2  ;;  %v786_v44 = vmax.f32 %v605_v42, 0.0  ;;  %v128_v42 = vld [vmem:[%s1920_s0 + $0x390] sm:$0xff] }
  0xcd   :  { %v489_v45 = vadd.f32 %v1340_v31, %v488_v43  ;;  %v71_v43 = vld [vmem:[%s1920_s0 + $0x1c8] sm:$0xff] }
  0xce   :  { %v1493_v49 = vpop.f32.mrf.mxu3  ;;  %851 = vst.msk [vmem:[%s1922_s3 + $0x28] sm:$0xff] %vm845_vm1, %v786_v44 }
  0xcf   :  { %v613_v46 = vpop.f32.mrf.mxu1  ;;  %v698_v50 = vadd.f32 %v1390_v57, %v489_v45  ;;  %v398_v51 = vpop.f32.mrf.mxu0 }
  0xd0   :  { %v399_v55 = vadd.f32 %v1340_v31, %v398_v51  ;;  %v137_v51 = vld [vmem:[%s1920_s0 + $0x3d8] sm:$0xff] }
  0xd1   :  { %v817_v54 = vmax.f32 %v698_v50, 0.0  ;;  %538 = vmatmul.f32.gmra.mxu2 %v120_v47  ;;  %v66_v47 = vld [vmem:[%s1920_s0 + $0x1a0] sm:$0xff] }
  0xd2   :  { %938 = vmatmul.msk.f32.gmra.mxu1 %vm170_vm0, %v63_v48  ;;  %v608_v57 = vadd.f32 %v607_v16, %v399_v55  ;;  %445 = vmatmul.f32.gmra.mxu0 %v58_v53 }
  0xd3   :  { %882 = vst.msk [vmem:[%s1922_s3 + $0x120] sm:$0xff] %vm845_vm1, %v817_v54  ;;  %971 = vmatmul.msk.f32.gmra.mxu3 %vm170_vm0, %v129_v56 }
  0xd4   :  { %v491_v58 = vpop.f32.mrf.mxu2  ;;  %v787_v59 = vmax.f32 %v608_v57, 0.0  ;;  %v130_v57 = vld [vmem:[%s1920_s0 + $0x3a0] sm:$0xff] }
  0xd5   :  { %v492_v60 = vadd.f32 %v1340_v31, %v491_v58  ;;  %v73_v58 = vld [vmem:[%s1920_s0 + $0x1d8] sm:$0xff] }
  0xd6   :  { %v1520_v0 = vpop.f32.mrf.mxu3  ;;  %852 = vst.msk [vmem:[%s1922_s3 + $0x30] sm:$0xff] %vm845_vm1, %v787_v59 }
  0xd7   :  { %v616_v61 = vpop.f32.mrf.mxu1  ;;  %v701_v1 = vadd.f32 %v1412_v5, %v492_v60  ;;  %v401_v2 = vpop.f32.mrf.mxu0 }
  0xd8   :  { %v402_v6 = vadd.f32 %v1340_v31, %v401_v2  ;;  %v139_v2 = vld [vmem:[%s1920_s0 + $0x3e8] sm:$0xff] }
  0xd9   :  { %v818_v4 = vmax.f32 %v701_v1, 0.0  ;;  %541 = vmatmul.f32.gmra.mxu2 %v122_v62  ;;  %v68_v62 = vld [vmem:[%s1920_s0 + $0x1b0] sm:$0xff] }
  0xda   :  { %939 = vmatmul.msk.f32.gmra.mxu1 %vm170_vm0, %v65_v63  ;;  %v611_v5 = vadd.f32 %v610_v30, %v402_v6  ;;  %448 = vmatmul.f32.gmra.mxu0 %v60_v3 }
  0xdb   :  { %883 = vst.msk [vmem:[%s1922_s3 + $0x128] sm:$0xff] %vm845_vm1, %v818_v4  ;;  %972 = vmatmul.msk.f32.gmra.mxu3 %vm170_vm0, %v131_v7 }
  0xdc   :  { %v494_v8 = vpop.f32.mrf.mxu2  ;;  %v788_v9 = vmax.f32 %v611_v5, 0.0  ;;  %v132_v5 = vld [vmem:[%s1920_s0 + $0x3b0] sm:$0xff] }
  0xdd   :  { %v495_v10 = vadd.f32 %v1340_v31, %v494_v8  ;;  %v75_v8 = vld [vmem:[%s1920_s0 + $0x1e8] sm:$0xff] }
  0xde   :  { %v1547_v14 = vpop.f32.mrf.mxu3  ;;  %853 = vst.msk [vmem:[%s1922_s3 + $0x38] sm:$0xff] %vm845_vm1, %v788_v9 }
  0xdf   :  { %v619_v11 = vpop.f32.mrf.mxu1  ;;  %v704_v15 = vadd.f32 %v1439_v19, %v495_v10  ;;  %v404_v16 = vpop.f32.mrf.mxu0 }
  0xe0   :  { %v405_v20 = vadd.f32 %v1340_v31, %v404_v16  ;;  %v141_v16 = vld [vmem:[%s1920_s0 + $0x3f8] sm:$0xff] }
  0xe1   :  { %v819_v18 = vmax.f32 %v704_v15, 0.0  ;;  %544 = vmatmul.f32.gmra.mxu2 %v124_v12  ;;  %v70_v12 = vld [vmem:[%s1920_s0 + $0x1c0] sm:$0xff] }
  0xe2   :  { %940 = vmatmul.msk.f32.gmra.mxu1 %vm170_vm0, %v67_v13  ;;  %v614_v19 = vadd.f32 %v613_v46, %v405_v20  ;;  %451 = vmatmul.f32.gmra.mxu0 %v62_v17 }
  0xe3   :  { %884 = vst.msk [vmem:[%s1922_s3 + $0x130] sm:$0xff] %vm845_vm1, %v819_v18  ;;  %973 = vmatmul.msk.f32.gmra.mxu3 %vm170_vm0, %v133_v21 }
  0xe4   :  { %v497_v22 = vpop.f32.mrf.mxu2  ;;  %v789_v23 = vmax.f32 %v614_v19, 0.0  ;;  %v134_v19 = vld [vmem:[%s1920_s0 + $0x3c0] sm:$0xff] }
  0xe5   :  { %v498_v24 = vadd.f32 %v1340_v31, %v497_v22  ;;  %v77_v22 = vld [vmem:[%s1920_s0 + $0x1f8] sm:$0xff] }
  0xe6   :  { %v1574_v28 = vpop.f32.mrf.mxu3  ;;  %854 = vst.msk [vmem:[%s1922_s3 + $0x40] sm:$0xff] %vm845_vm1, %v789_v23 }
  0xe7   :  { %v622_v25 = vpop.f32.mrf.mxu1  ;;  %v707_v29 = vadd.f32 %v1466_v34, %v498_v24  ;;  %v407_v30 = vpop.f32.mrf.mxu0 }
  0xe8   :  { %v408_v35 = vadd.f32 %v1340_v31, %v407_v30 }
  0xe9   :  { %v820_v33 = vmax.f32 %v707_v29, 0.0  ;;  %547 = vmatmul.f32.gmra.mxu2 %v126_v26  ;;  %v72_v26 = vld [vmem:[%s1920_s0 + $0x1d0] sm:$0xff] }
  0xea   :  { %941 = vmatmul.msk.f32.gmra.mxu1 %vm170_vm0, %v69_v27  ;;  %v617_v34 = vadd.f32 %v616_v61, %v408_v35  ;;  %454 = vmatmul.f32.gmra.mxu0 %v64_v32 }
  0xeb   :  { %885 = vst.msk [vmem:[%s1922_s3 + $0x138] sm:$0xff] %vm845_vm1, %v820_v33  ;;  %974 = vmatmul.msk.f32.gmra.mxu3 %vm170_vm0, %v135_v36  ;;  %v136_v36 = vld [vmem:[%s1920_s0 + $0x3d0] sm:$0xff] }
  0xec   :  { %v500_v37 = vpop.f32.mrf.mxu2  ;;  %v790_v38 = vmax.f32 %v617_v34, 0.0  ;;  %v79_v34 = vld [vmem:[%s1920_s0 + $0x208] sm:$0xff] }
  0xed   :  { %v501_v39 = vadd.f32 %v1340_v31, %v500_v37 }
  0xee   :  { %v1601_v44 = vpop.f32.mrf.mxu3  ;;  %855 = vst.msk [vmem:[%s1922_s3 + $0x48] sm:$0xff] %vm845_vm1, %v790_v38 }
  0xef   :  { %v625_v40 = vpop.f32.mrf.mxu1  ;;  %v710_v45 = vadd.f32 %v1493_v49, %v501_v39  ;;  %v410_v46 = vpop.f32.mrf.mxu0 }
  0xf0   :  { %v411_v50 = vadd.f32 %v1340_v31, %v410_v46 }
  0xf1   :  { %v821_v48 = vmax.f32 %v710_v45, 0.0  ;;  %550 = vmatmul.f32.gmra.mxu2 %v128_v42 }
  0xf2   :  { %942 = vmatmul.msk.f32.gmra.mxu1 %vm170_vm0, %v71_v43  ;;  %v620_v49 = vadd.f32 %v619_v11, %v411_v50  ;;  %457 = vmatmul.f32.gmra.mxu0 %v66_v47  ;;  %v138_v50 = vld [vmem:[%s1920_s0 + $0x3e0] sm:$0xff] }
  0xf3   :  { %886 = vst.msk [vmem:[%s1922_s3 + $0x140] sm:$0xff] %vm845_vm1, %v821_v48  ;;  %975 = vmatmul.msk.f32.gmra.mxu3 %vm170_vm0, %v137_v51 }
  0xf4   :  { %v503_v53 = vpop.f32.mrf.mxu2  ;;  %v791_v54 = vmax.f32 %v620_v49, 0.0 }
  0xf5   :  { %v504_v55 = vadd.f32 %v1340_v31, %v503_v53 }
  0xf6   :  { %v1628_v59 = vpop.f32.mrf.mxu3  ;;  %856 = vst.msk [vmem:[%s1922_s3 + $0x50] sm:$0xff] %vm845_vm1, %v791_v54 }
  0xf7   :  { %v628_v56 = vpop.f32.mrf.mxu1  ;;  %v713_v60 = vadd.f32 %v1520_v0, %v504_v55  ;;  %v413_v61 = vpop.f32.mrf.mxu0 }
  0xf8   :  { %v414_v1 = vadd.f32 %v1340_v31, %v413_v61 }
  0xf9   :  { %v822_v63 = vmax.f32 %v713_v60, 0.0  ;;  %553 = vmatmul.f32.gmra.mxu2 %v130_v57 }
  0xfa   :  { %943 = vmatmul.msk.f32.gmra.mxu1 %vm170_vm0, %v73_v58  ;;  %v623_v0 = vadd.f32 %v622_v25, %v414_v1  ;;  %460 = vmatmul.f32.gmra.mxu0 %v68_v62 }
  0xfb   :  { %887 = vst.msk [vmem:[%s1922_s3 + $0x148] sm:$0xff] %vm845_vm1, %v822_v63  ;;  %976 = vmatmul.msk.f32.gmra.mxu3 %vm170_vm0, %v139_v2 }
  0xfc   :  { %v506_v3 = vpop.f32.mrf.mxu2  ;;  %v792_v4 = vmax.f32 %v623_v0, 0.0 }
  0xfd   :  { %v507_v6 = vadd.f32 %v1340_v31, %v506_v3 }
  0xfe   :  { %v1655_v9 = vpop.f32.mrf.mxu3  ;;  %857 = vst.msk [vmem:[%s1922_s3 + $0x58] sm:$0xff] %vm845_vm1, %v792_v4 }
  0xff   :  { %v631_v7 = vpop.f32.mrf.mxu1  ;;  %v716_v10 = vadd.f32 %v1547_v14, %v507_v6  ;;  %v416_v11 = vpop.f32.mrf.mxu0 }
 0x100   :  { %v417_v15 = vadd.f32 %v1340_v31, %v416_v11 }
 0x101   :  { %v823_v13 = vmax.f32 %v716_v10, 0.0  ;;  %556 = vmatmul.f32.gmra.mxu2 %v132_v5 }
 0x102   :  { %944 = vmatmul.msk.f32.gmra.mxu1 %vm170_vm0, %v75_v8  ;;  %v626_v14 = vadd.f32 %v625_v40, %v417_v15  ;;  %463 = vmatmul.f32.gmra.mxu0 %v70_v12  ;;  %v74_v40 = vld [vmem:[%s1920_s0 + $0x1e0] sm:$0xff] }
 0x103   :  { %888 = vst.msk [vmem:[%s1922_s3 + $0x150] sm:$0xff] %vm845_vm1, %v823_v13  ;;  %977 = vmatmul.msk.f32.gmra.mxu3 %vm170_vm0, %v141_v16 }
 0x104   :  { %v509_v17 = vpop.f32.mrf.mxu2  ;;  %v793_v18 = vmax.f32 %v626_v14, 0.0 }
 0x105   :  { %v510_v20 = vadd.f32 %v1340_v31, %v509_v17 }
 0x106   :  { %v1682_v23 = vpop.f32.mrf.mxu3  ;;  %858 = vst.msk [vmem:[%s1922_s3 + $0x60] sm:$0xff] %vm845_vm1, %v793_v18 }
 0x107   :  { %v634_v21 = vpop.f32.mrf.mxu1  ;;  %v719_v24 = vadd.f32 %v1574_v28, %v510_v20  ;;  %v419_v25 = vpop.f32.mrf.mxu0 }
 0x108   :  { %v420_v29 = vadd.f32 %v1340_v31, %v419_v25 }
 0x109   :  { %v824_v27 = vmax.f32 %v719_v24, 0.0  ;;  %559 = vmatmul.f32.gmra.mxu2 %v134_v19 }
 0x10a   :  { %945 = vmatmul.msk.f32.gmra.mxu1 %vm170_vm0, %v77_v22  ;;  %v629_v30 = vadd.f32 %v628_v56, %v420_v29  ;;  %466 = vmatmul.f32.gmra.mxu0 %v72_v26 }
 0x10b   :  { %889 = vst.msk [vmem:[%s1922_s3 + $0x158] sm:$0xff] %vm845_vm1, %v824_v27 }
 0x10c   :  { %v512_v32 = vpop.f32.mrf.mxu2  ;;  %v794_v28 = vmax.f32 %v629_v30, 0.0 }
 0x10d   :  { %v513_v33 = vadd.f32 %v1340_v31, %v512_v32 }
 0x10e   :  { %v733_v37 = vpop.f32.mrf.mxu3  ;;  %859 = vst.msk [vmem:[%s1922_s3 + $0x68] sm:$0xff] %vm845_vm1, %v794_v28 }
 0x10f   :  { %v637_v35 = vpop.f32.mrf.mxu1  ;;  %v722_v38 = vadd.f32 %v1601_v44, %v513_v33  ;;  %v422_v39 = vpop.f32.mrf.mxu0 }
 0x110   :  { %v423_v43 = vadd.f32 %v1340_v31, %v422_v39 }
 0x111   :  { %v825_v42 = vmax.f32 %v722_v38, 0.0  ;;  %562 = vmatmul.f32.gmra.mxu2 %v136_v36 }
 0x112   :  { %946 = vmatmul.msk.f32.gmra.mxu1 %vm170_vm0, %v79_v34  ;;  %v632_v45 = vadd.f32 %v631_v7, %v423_v43  ;;  %469 = vmatmul.f32.gmra.mxu0 %v74_v40 }
 0x113   :  { %890 = vst.msk [vmem:[%s1922_s3 + $0x160] sm:$0xff] %vm845_vm1, %v825_v42 }
 0x114   :  { %v515_v46 = vpop.f32.mrf.mxu2  ;;  %v795_v44 = vmax.f32 %v632_v45, 0.0 }
 0x115   :  { %v516_v47 = vadd.f32 %v1340_v31, %v515_v46 }
 0x116   :  { %860 = vst.msk [vmem:[%s1922_s3 + $0x70] sm:$0xff] %vm845_vm1, %v795_v44  ;;  %v736_v53 = vpop.f32.mrf.mxu3 }
 0x117   :  { %v640_v48 = vpop.f32.mrf.mxu1  ;;  %v725_v51 = vadd.f32 %v1628_v59, %v516_v47  ;;  %v425_v49 = vpop.f32.mrf.mxu0  ;;  %v140_v59 = vld [vmem:[%s1920_s0 + $0x3f0] sm:$0xff] }
 0x118   :  { %v426_v55 = vadd.f32 %v1340_v31, %v425_v49 }
 0x119   :  { %v826_v54 = vmax.f32 %v725_v51, 0.0  ;;  %565 = vmatmul.f32.gmra.mxu2 %v138_v50 }
 0x11a   :  { %v635_v56 = vadd.f32 %v634_v21, %v426_v55 }
 0x11b   :  { %891 = vst.msk [vmem:[%s1922_s3 + $0x168] sm:$0xff] %vm845_vm1, %v826_v54 }
 0x11c   :  { %v518_v57 = vpop.f32.mrf.mxu2  ;;  %v796_v58 = vmax.f32 %v635_v56, 0.0 }
 0x11d   :  { %v519_v60 = vadd.f32 %v1340_v31, %v518_v57 }
 0x11e   :  { %861 = vst.msk [vmem:[%s1922_s3 + $0x78] sm:$0xff] %vm845_vm1, %v796_v58  ;;  %v739_v0 = vpop.f32.mrf.mxu3 }
 0x11f   :  { %v643_v61 = vpop.f32.mrf.mxu1  ;;  %v728_v62 = vadd.f32 %v1655_v9, %v519_v60  ;;  %v428_v63 = vpop.f32.mrf.mxu0 }
 0x120   :  { %v429_v2 = vadd.f32 %v1340_v31, %v428_v63 }
 0x121   :  { %v827_v1 = vmax.f32 %v728_v62, 0.0  ;;  %568 = vmatmul.f32.gmra.mxu2 %v140_v59 }
 0x122   :  { %v638_v3 = vadd.f32 %v637_v35, %v429_v2 }
 0x123   :  { %892 = vst.msk [vmem:[%s1922_s3 + $0x170] sm:$0xff] %vm845_vm1, %v827_v1 }
 0x124   :  { %v521_v4 = vpop.f32.mrf.mxu2  ;;  %v797_v6 = vmax.f32 %v638_v3, 0.0 }
 0x125   :  { %v522_v7 = vadd.f32 %v1340_v31, %v521_v4 }
 0x126   :  { %862 = vst.msk [vmem:[%s1922_s3 + $0x80] sm:$0xff] %vm845_vm1, %v797_v6  ;;  %v742_v15 = vpop.f32.mrf.mxu3 }
 0x127   :  { %v646_v5 = vpop.f32.mrf.mxu1  ;;  %v731_v8 = vadd.f32 %v1682_v23, %v522_v7  ;;  %v431_v9 = vpop.f32.mrf.mxu0 }
 0x128   :  { %v432_v11 = vadd.f32 %v1340_v31, %v431_v9 }
 0x129   :  { %v828_v10 = vmax.f32 %v731_v8, 0.0 }
 0x12a   :  { %v641_v12 = vadd.f32 %v640_v48, %v432_v11 }
 0x12b   :  { %893 = vst.msk [vmem:[%s1922_s3 + $0x178] sm:$0xff] %vm845_vm1, %v828_v10 }
 0x12c   :  { %v524_v13 = vpop.f32.mrf.mxu2  ;;  %v798_v16 = vmax.f32 %v641_v12, 0.0 }
 0x12d   :  { %v525_v14 = vadd.f32 %v1340_v31, %v524_v13 }
 0x12e   :  { %863 = vst.msk [vmem:[%s1922_s3 + $0x88] sm:$0xff] %vm845_vm1, %v798_v16  ;;  %v745_v27 = vpop.f32.mrf.mxu3 }
 0x12f   :  { %v649_v17 = vpop.f32.mrf.mxu1  ;;  %v734_v18 = vadd.f32 %v733_v37, %v525_v14  ;;  %v434_v20 = vpop.f32.mrf.mxu0 }
 0x130   :  { %v435_v19 = vadd.f32 %v1340_v31, %v434_v20 }
 0x131   :  { %v829_v21 = vmax.f32 %v734_v18, 0.0 }
 0x132   :  { %v644_v22 = vadd.f32 %v643_v61, %v435_v19 }
 0x133   :  { %894 = vst.msk [vmem:[%s1922_s3 + $0x180] sm:$0xff] %vm845_vm1, %v829_v21 }
 0x134   :  { %v527_v23 = vpop.f32.mrf.mxu2  ;;  %v799_v24 = vmax.f32 %v644_v22, 0.0 }
 0x135   :  { %v528_v25 = vadd.f32 %v1340_v31, %v527_v23 }
 0x136   :  { %864 = vst.msk [vmem:[%s1922_s3 + $0x90] sm:$0xff] %vm845_vm1, %v799_v24  ;;  %v748_v40 = vpop.f32.mrf.mxu3 }
 0x137   :  { %v652_v26 = vpop.f32.mrf.mxu1  ;;  %v737_v29 = vadd.f32 %v736_v53, %v528_v25  ;;  %v437_v30 = vpop.f32.mrf.mxu0 }
 0x138   :  { %v438_v28 = vadd.f32 %v1340_v31, %v437_v30 }
 0x139   :  { %v830_v32 = vmax.f32 %v737_v29, 0.0 }
 0x13a   :  { %v647_v33 = vadd.f32 %v646_v5, %v438_v28 }
 0x13b   :  { %895 = vst.msk [vmem:[%s1922_s3 + $0x188] sm:$0xff] %vm845_vm1, %v830_v32 }
 0x13c   :  { %v530_v35 = vpop.f32.mrf.mxu2  ;;  %v800_v36 = vmax.f32 %v647_v33, 0.0 }
 0x13d   :  { %v531_v34 = vadd.f32 %v1340_v31, %v530_v35 }
 0x13e   :  { %865 = vst.msk [vmem:[%s1922_s3 + $0x98] sm:$0xff] %vm845_vm1, %v800_v36  ;;  %v751_v54 = vpop.f32.mrf.mxu3 }
 0x13f   :  { %v655_v37 = vpop.f32.mrf.mxu1  ;;  %v740_v38 = vadd.f32 %v739_v0, %v531_v34  ;;  %v440_v39 = vpop.f32.mrf.mxu0 }
 0x140   :  { %v441_v43 = vadd.f32 %v1340_v31, %v440_v39 }
 0x141   :  { %v831_v42 = vmax.f32 %v740_v38, 0.0 }
 0x142   :  { %v650_v45 = vadd.f32 %v649_v17, %v441_v43 }
 0x143   :  { %896 = vst.msk [vmem:[%s1922_s3 + $0x190] sm:$0xff] %vm845_vm1, %v831_v42 }
 0x144   :  { %v533_v46 = vpop.f32.mrf.mxu2  ;;  %v801_v44 = vmax.f32 %v650_v45, 0.0 }
 0x145   :  { %v534_v47 = vadd.f32 %v1340_v31, %v533_v46 }
 0x146   :  { %866 = vst.msk [vmem:[%s1922_s3 + $0xa0] sm:$0xff] %vm845_vm1, %v801_v44  ;;  %v754_v0 = vpop.f32.mrf.mxu3 }
 0x147   :  { %v658_v48 = vpop.f32.mrf.mxu1  ;;  %v743_v50 = vadd.f32 %v742_v15, %v534_v47  ;;  %v443_v51 = vpop.f32.mrf.mxu0 }
 0x148   :  { %v444_v53 = vadd.f32 %v1340_v31, %v443_v51 }
 0x149   :  { %v832_v49 = vmax.f32 %v743_v50, 0.0 }
 0x14a   :  { %v653_v55 = vadd.f32 %v652_v26, %v444_v53 }
 0x14b   :  { %897 = vst.msk [vmem:[%s1922_s3 + $0x198] sm:$0xff] %vm845_vm1, %v832_v49 }
 0x14c   :  { %v536_v56 = vpop.f32.mrf.mxu2  ;;  %v802_v57 = vmax.f32 %v653_v55, 0.0 }
 0x14d   :  { %v537_v58 = vadd.f32 %v1340_v31, %v536_v56 }
 0x14e   :  { %867 = vst.msk [vmem:[%s1922_s3 + $0xa8] sm:$0xff] %vm845_vm1, %v802_v57  ;;  %v757_v16 = vpop.f32.mrf.mxu3 }
 0x14f   :  { %v661_v60 = vpop.f32.mrf.mxu1  ;;  %v746_v61 = vadd.f32 %v745_v27, %v537_v58  ;;  %v446_v59 = vpop.f32.mrf.mxu0 }
 0x150   :  { %v447_v63 = vadd.f32 %v1340_v31, %v446_v59 }
 0x151   :  { %v833_v62 = vmax.f32 %v746_v61, 0.0 }
 0x152   :  { %v656_v1 = vadd.f32 %v655_v37, %v447_v63 }
 0x153   :  { %898 = vst.msk [vmem:[%s1922_s3 + $0x1a0] sm:$0xff] %vm845_vm1, %v833_v62 }
 0x154   :  { %v539_v2 = vpop.f32.mrf.mxu2  ;;  %v803_v3 = vmax.f32 %v656_v1, 0.0  ;;  %v474_v1 = vadd.f32 %v1340_v31, %v1359_v41 }
 0x155   :  { %v540_v4 = vadd.f32 %v1340_v31, %v539_v2 }
 0x156   :  { %868 = vst.msk [vmem:[%s1922_s3 + $0xb0] sm:$0xff] %vm845_vm1, %v803_v3  ;;  %v760_v27 = vpop.f32.mrf.mxu3 }
 0x157   :  { %v664_v6 = vpop.f32.mrf.mxu1  ;;  %v749_v7 = vadd.f32 %v748_v40, %v540_v4  ;;  %v449_v5 = vpop.f32.mrf.mxu0 }
 0x158   :  { %v450_v9 = vadd.f32 %v1340_v31, %v449_v5 }
 0x159   :  { %v834_v8 = vmax.f32 %v749_v7, 0.0 }
 0x15a   :  { %v659_v10 = vadd.f32 %v658_v48, %v450_v9 }
 0x15b   :  { %899 = vst.msk [vmem:[%s1922_s3 + $0x1a8] sm:$0xff] %vm845_vm1, %v834_v8 }
 0x15c   :  { %v542_v11 = vpop.f32.mrf.mxu2  ;;  %v804_v12 = vmax.f32 %v659_v10, 0.0 }
 0x15d   :  { %v543_v13 = vadd.f32 %v1340_v31, %v542_v11 }
 0x15e   :  { %869 = vst.msk [vmem:[%s1922_s3 + $0xb8] sm:$0xff] %vm845_vm1, %v804_v12  ;;  %v763_v40 = vpop.f32.mrf.mxu3  ;;  %v477_v12 = vadd.f32 %v1340_v31, %v1382_v52 }
 0x15f   :  { %v667_v15 = vpop.f32.mrf.mxu1  ;;  %v752_v14 = vadd.f32 %v751_v54, %v543_v13  ;;  %v452_v17 = vpop.f32.mrf.mxu0 }
 0x160   :  { %v453_v20 = vadd.f32 %v1340_v31, %v452_v17 }
 0x161   :  { %v835_v18 = vmax.f32 %v752_v14, 0.0 }
 0x162   :  { %v662_v21 = vadd.f32 %v661_v60, %v453_v20 }
 0x163   :  { %900 = vst.msk [vmem:[%s1922_s3 + $0x1b0] sm:$0xff] %vm845_vm1, %v835_v18 }
 0x164   :  { %v545_v19 = vpop.f32.mrf.mxu2  ;;  %v805_v22 = vmax.f32 %v662_v21, 0.0 }
 0x165   :  { %v546_v23 = vadd.f32 %v1340_v31, %v545_v19 }
 0x166   :  { %870 = vst.msk [vmem:[%s1922_s3 + $0xc0] sm:$0xff] %vm845_vm1, %v805_v22  ;;  %v766_v54 = vpop.f32.mrf.mxu3 }
 0x167   :  { %v670_v24 = vpop.f32.mrf.mxu1  ;;  %v755_v25 = vadd.f32 %v754_v0, %v546_v23  ;;  %v455_v26 = vpop.f32.mrf.mxu0 }
 0x168   :  { %v456_v30 = vadd.f32 %v1340_v31, %v455_v26 }
 0x169   :  { %v836_v29 = vmax.f32 %v755_v25, 0.0 }
 0x16a   :  { %v665_v32 = vadd.f32 %v664_v6, %v456_v30 }
 0x16b   :  { %901 = vst.msk [vmem:[%s1922_s3 + $0x1b8] sm:$0xff] %vm845_vm1, %v836_v29 }
 0x16c   :  { %v548_v28 = vpop.f32.mrf.mxu2  ;;  %v806_v33 = vmax.f32 %v665_v32, 0.0 }
 0x16d   :  { %v549_v35 = vadd.f32 %v1340_v31, %v548_v28 }
 0x16e   :  { %871 = vst.msk [vmem:[%s1922_s3 + $0xc8] sm:$0xff] %vm845_vm1, %v806_v33  ;;  %v769_v4 = vpop.f32.mrf.mxu3 }
 0x16f   :  { %v673_v36 = vpop.f32.mrf.mxu1  ;;  %v758_v34 = vadd.f32 %v757_v16, %v549_v35  ;;  %v458_v37 = vpop.f32.mrf.mxu0 }
 0x170   :  { %v459_v39 = vadd.f32 %v1340_v31, %v458_v37 }
 0x171   :  { %v837_v38 = vmax.f32 %v758_v34, 0.0 }
 0x172   :  { %v668_v42 = vadd.f32 %v667_v15, %v459_v39 }
 0x173   :  { %902 = vst.msk [vmem:[%s1922_s3 + $0x1c0] sm:$0xff] %vm845_vm1, %v837_v38 }
 0x174   :  { %v551_v43 = vpop.f32.mrf.mxu2  ;;  %v807_v45 = vmax.f32 %v668_v42, 0.0 }
 0x175   :  { %v552_v46 = vadd.f32 %v1340_v31, %v551_v43 }
 0x176   :  { %872 = vst.msk [vmem:[%s1922_s3 + $0xd0] sm:$0xff] %vm845_vm1, %v807_v45  ;;  %v772_v20 = vpop.f32.mrf.mxu3 }
 0x177   :  { %v676_v44 = vpop.f32.mrf.mxu1  ;;  %v761_v47 = vadd.f32 %v760_v27, %v552_v46  ;;  %v461_v48 = vpop.f32.mrf.mxu0 }
 0x178   :  { %v462_v51 = vadd.f32 %v1340_v31, %v461_v48 }
 0x179   :  { %v838_v50 = vmax.f32 %v761_v47, 0.0 }
 0x17a   :  { %v671_v49 = vadd.f32 %v670_v24, %v462_v51 }
 0x17b   :  { %903 = vst.msk [vmem:[%s1922_s3 + $0x1c8] sm:$0xff] %vm845_vm1, %v838_v50 }
 0x17c   :  { %v554_v53 = vpop.f32.mrf.mxu2  ;;  %v808_v55 = vmax.f32 %v671_v49, 0.0 }
 0x17d   :  { %v555_v56 = vadd.f32 %v1340_v31, %v554_v53 }
 0x17e   :  { %873 = vst.msk [vmem:[%s1922_s3 + $0xd8] sm:$0xff] %vm845_vm1, %v808_v55  ;;  %v775_v29 = vpop.f32.mrf.mxu3 }
 0x17f   :  { %v679_v57 = vpop.f32.mrf.mxu1  ;;  %v764_v58 = vadd.f32 %v763_v40, %v555_v56  ;;  %v464_v60 = vpop.f32.mrf.mxu0 }
 0x180   :  { %v465_v59 = vadd.f32 %v1340_v31, %v464_v60 }
 0x181   :  { %v839_v61 = vmax.f32 %v764_v58, 0.0 }
 0x182   :  { %v674_v62 = vadd.f32 %v673_v36, %v465_v59 }
 0x183   :  { %904 = vst.msk [vmem:[%s1922_s3 + $0x1d0] sm:$0xff] %vm845_vm1, %v839_v61 }
 0x184   :  { %v557_v63 = vpop.f32.mrf.mxu2  ;;  %v809_v2 = vmax.f32 %v674_v62, 0.0 }
 0x185   :  { %v558_v0 = vadd.f32 %v1340_v31, %v557_v63 }
 0x186   :  { %874 = vst.msk [vmem:[%s1922_s3 + $0xe0] sm:$0xff] %vm845_vm1, %v809_v2  ;;  %v778_v36 = vpop.f32.mrf.mxu3 }
 0x187   :  { %v682_v3 = vpop.f32.mrf.mxu1  ;;  %v767_v7 = vadd.f32 %v766_v54, %v558_v0  ;;  %v467_v5 = vpop.f32.mrf.mxu0 }
 0x188   :  { %v683_v6 = vadd.f32 %v682_v3, %v474_v1  ;;  %v468_v10 = vadd.f32 %v1340_v31, %v467_v5 }
 0x189   :  { %v840_v9 = vmax.f32 %v767_v7, 0.0 }
 0x18a   :  { %v812_v8 = vmax.f32 %v683_v6, 0.0  ;;  %v677_v41 = vadd.f32 %v676_v44, %v468_v10 }
 0x18b   :  { %905 = vst.msk [vmem:[%s1922_s3 + $0x1d8] sm:$0xff] %vm845_vm1, %v840_v9 }
 0x18c   :  { %877 = vst.msk [vmem:[%s1922_s3 + $0xf8] sm:$0xff] %vm845_vm1, %v812_v8  ;;  %v560_v11 = vpop.f32.mrf.mxu2  ;;  %v810_v13 = vmax.f32 %v677_v41, 0.0 }
 0x18d   :  { %v561_v15 = vadd.f32 %v1340_v31, %v560_v11 }
 0x18e   :  { %875 = vst.msk [vmem:[%s1922_s3 + $0xe8] sm:$0xff] %vm845_vm1, %v810_v13 }
 0x18f   :  { %v685_v16 = vpop.f32.mrf.mxu1  ;;  %v770_v17 = vadd.f32 %v769_v4, %v561_v15  ;;  %v470_v18 = vpop.f32.mrf.mxu0 }
 0x190   :  { %v686_v14 = vadd.f32 %v685_v16, %v477_v12  ;;  %v471_v22 = vadd.f32 %v1340_v31, %v470_v18 }
 0x191   :  { %v841_v19 = vmax.f32 %v770_v17, 0.0 }
 0x192   :  { %v813_v21 = vmax.f32 %v686_v14, 0.0  ;;  %v680_v52 = vadd.f32 %v679_v57, %v471_v22 }
 0x193   :  { %906 = vst.msk [vmem:[%s1922_s3 + $0x1e0] sm:$0xff] %vm845_vm1, %v841_v19 }
 0x194   :  { %878 = vst.msk [vmem:[%s1922_s3 + $0x100] sm:$0xff] %vm845_vm1, %v813_v21  ;;  %v563_v23 = vpop.f32.mrf.mxu2  ;;  %v811_v24 = vmax.f32 %v680_v52, 0.0 }
 0x195   :  { %v564_v25 = vadd.f32 %v1340_v31, %v563_v23 }
 0x196   :  { %876 = vst.msk [vmem:[%s1922_s3 + $0xf0] sm:$0xff] %vm845_vm1, %v811_v24 }
 0x197   :  { %v773_v26 = vadd.f32 %v772_v20, %v564_v25 }
 0x199   :  { %v842_v27 = vmax.f32 %v773_v26, 0.0 }
 0x19b   :  { %907 = vst.msk [vmem:[%s1922_s3 + $0x1e8] sm:$0xff] %vm845_vm1, %v842_v27 }
 0x19c   :  { %v566_v30 = vpop.f32.mrf.mxu2 }
 0x19d   :  { %v567_v32 = vadd.f32 %v1340_v31, %v566_v30 }
 0x19f   :  { %v776_v28 = vadd.f32 %v775_v29, %v567_v32 }
 0x1a1   :  { %v843_v33 = vmax.f32 %v776_v28, 0.0 }
 0x1a3   :  { %908 = vst.msk [vmem:[%s1922_s3 + $0x1f0] sm:$0xff] %vm845_vm1, %v843_v33 }
 0x1a4   :  { %v569_v35 = vpop.f32.mrf.mxu2 }
 0x1a5   :  { %v570_v34 = vadd.f32 %v1340_v31, %v569_v35 }
 0x1a7   :  { %v779_v37 = vadd.f32 %v778_v36, %v570_v34 }
 0x1a9   :  { %v844_v38 = vmax.f32 %v779_v37, 0.0 }
 0x1ab   :  { %909 = vst.msk [vmem:[%s1922_s3 + $0x1f8] sm:$0xff] %vm845_vm1, %v844_v38 }

// kernel: perception_forward.4
= control target key start
LH: loop header
LB: loop body
LE: loop exit
PB: predicated region body
PF: predicated region fallthrough
CT: control target
= control target key end

     0   :  { %vm371_vm0 = vcmask 523264   ;;  %vm384_vm1 = vcmask 517120   ;;  %s828_s1 = inlined_call_operand.vmem [shape: f32[512,64], index: 1, kind: input, shape index: {}]   ;;  %s829_s2 = inlined_call_operand.vmem [shape: f32[1,64], index: 2, kind: input, shape index: {}]   ;;  %s830_s0 = inlined_call_operand.vmem [shape: f32[98,512], index: 0, kind: input, shape index: {}]   ;;  %s831_s3 = inlined_call_operand.vmem [shape: f32[98,64], index: 3, kind: output, shape index: {}]  }
   0x1   :  { %v113_v0 = vld [vmem:[%s828_s1 + $0x178] sm:$0xff]  ;;  %v112_v2 = vld [vmem:[%s828_s1 + $0x170] sm:$0xff]  ;;  %v111_v6 = vld [vmem:[%s828_s1 + $0x168] sm:$0xff] }
   0x2   :  { %v81_v1 = vld [vmem:[%s828_s1 + $0x78] sm:$0xff]  ;;  %246 = vmatpush.msra.mxu2 %v113_v0  ;;  %v80_v4 = vld [vmem:[%s828_s1 + $0x70] sm:$0xff]  ;;  %v79_v8 = vld [vmem:[%s828_s1 + $0x68] sm:$0xff] }
   0x3   :  { %134 = vmatpush.msra.mxu0 %v81_v1  ;;  %v129_v3 = vld [vmem:[%s828_s1 + $0x1f8] sm:$0xff]  ;;  %v128_v7 = vld [vmem:[%s828_s1 + $0x1f0] sm:$0xff]  ;;  %v127_v10 = vld [vmem:[%s828_s1 + $0x1e8] sm:$0xff] }
   0x4   :  { %v97_v5 = vld [vmem:[%s828_s1 + $0xf8] sm:$0xff]  ;;  %302 = vmatpush.msra.mxu3 %v129_v3  ;;  %247 = vmatpush.msra.mxu2 %v112_v2  ;;  %v96_v9 = vld [vmem:[%s828_s1 + $0xf0] sm:$0xff]  ;;  %v110_v11 = vld [vmem:[%s828_s1 + $0x160] sm:$0xff] }
   0x5   :  { %190 = vmatpush.msra.mxu1 %v97_v5  ;;  %135 = vmatpush.msra.mxu0 %v80_v4  ;;  %v78_v12 = vld [vmem:[%s828_s1 + $0x60] sm:$0xff]  ;;  %v95_v13 = vld [vmem:[%s828_s1 + $0xe8] sm:$0xff]  ;;  %v109_v16 = vld [vmem:[%s828_s1 + $0x158] sm:$0xff] }
   0x6   :  { %303 = vmatpush.msra.mxu3 %v128_v7  ;;  %248 = vmatpush.msra.mxu2 %v111_v6  ;;  %v126_v14 = vld [vmem:[%s828_s1 + $0x1e0] sm:$0xff]  ;;  %v77_v17 = vld [vmem:[%s828_s1 + $0x58] sm:$0xff]  ;;  %v108_v20 = vld [vmem:[%s828_s1 + $0x150] sm:$0xff] }
   0x7   :  { %191 = vmatpush.msra.mxu1 %v96_v9  ;;  %136 = vmatpush.msra.mxu0 %v79_v8  ;;  %v94_v15 = vld [vmem:[%s828_s1 + $0xe0] sm:$0xff]  ;;  %v125_v18 = vld [vmem:[%s828_s1 + $0x1d8] sm:$0xff]  ;;  %v76_v21 = vld [vmem:[%s828_s1 + $0x50] sm:$0xff] }
   0x8   :  { %304 = vmatpush.msra.mxu3 %v127_v10  ;;  %249 = vmatpush.msra.mxu2 %v110_v11  ;;  %v93_v19 = vld [vmem:[%s828_s1 + $0xd8] sm:$0xff]  ;;  %v124_v22 = vld [vmem:[%s828_s1 + $0x1d0] sm:$0xff]  ;;  %v107_v24 = vld [vmem:[%s828_s1 + $0x148] sm:$0xff] }
   0x9   :  { %192 = vmatpush.msra.mxu1 %v95_v13  ;;  %137 = vmatpush.msra.mxu0 %v78_v12  ;;  %v92_v23 = vld [vmem:[%s828_s1 + $0xd0] sm:$0xff]  ;;  %v75_v25 = vld [vmem:[%s828_s1 + $0x48] sm:$0xff]  ;;  %v106_v28 = vld [vmem:[%s828_s1 + $0x140] sm:$0xff] }
   0xa   :  { %305 = vmatpush.msra.mxu3 %v126_v14  ;;  %250 = vmatpush.msra.mxu2 %v109_v16  ;;  %v123_v26 = vld [vmem:[%s828_s1 + $0x1c8] sm:$0xff]  ;;  %v74_v29 = vld [vmem:[%s828_s1 + $0x40] sm:$0xff]  ;;  %v105_v32 = vld [vmem:[%s828_s1 + $0x138] sm:$0xff] }
   0xb   :  { %193 = vmatpush.msra.mxu1 %v94_v15  ;;  %138 = vmatpush.msra.mxu0 %v77_v17  ;;  %v91_v27 = vld [vmem:[%s828_s1 + $0xc8] sm:$0xff]  ;;  %v122_v30 = vld [vmem:[%s828_s1 + $0x1c0] sm:$0xff]  ;;  %v73_v33 = vld [vmem:[%s828_s1 + $0x38] sm:$0xff] }
   0xc   :  { %306 = vmatpush.msra.mxu3 %v125_v18  ;;  %251 = vmatpush.msra.mxu2 %v108_v20  ;;  %v90_v31 = vld [vmem:[%s828_s1 + $0xc0] sm:$0xff]  ;;  %v121_v34 = vld [vmem:[%s828_s1 + $0x1b8] sm:$0xff]  ;;  %v104_v36 = vld [vmem:[%s828_s1 + $0x130] sm:$0xff] }
   0xd   :  { %194 = vmatpush.msra.mxu1 %v93_v19  ;;  %139 = vmatpush.msra.mxu0 %v76_v21  ;;  %v89_v35 = vld [vmem:[%s828_s1 + $0xb8] sm:$0xff]  ;;  %v72_v37 = vld [vmem:[%s828_s1 + $0x30] sm:$0xff]  ;;  %v103_v40 = vld [vmem:[%s828_s1 + $0x128] sm:$0xff] }
   0xe   :  { %307 = vmatpush.msra.mxu3 %v124_v22  ;;  %252 = vmatpush.msra.mxu2 %v107_v24  ;;  %v120_v38 = vld [vmem:[%s828_s1 + $0x1b0] sm:$0xff]  ;;  %v71_v41 = vld [vmem:[%s828_s1 + $0x28] sm:$0xff]  ;;  %v102_v44 = vld [vmem:[%s828_s1 + $0x120] sm:$0xff] }
   0xf   :  { %195 = vmatpush.msra.mxu1 %v92_v23  ;;  %140 = vmatpush.msra.mxu0 %v75_v25  ;;  %v88_v39 = vld [vmem:[%s828_s1 + $0xb0] sm:$0xff]  ;;  %v119_v42 = vld [vmem:[%s828_s1 + $0x1a8] sm:$0xff]  ;;  %v70_v45 = vld [vmem:[%s828_s1 + $0x20] sm:$0xff] }
  0x10   :  { %308 = vmatpush.msra.mxu3 %v123_v26  ;;  %253 = vmatpush.msra.mxu2 %v106_v28  ;;  %v87_v43 = vld [vmem:[%s828_s1 + $0xa8] sm:$0xff]  ;;  %v118_v46 = vld [vmem:[%s828_s1 + $0x1a0] sm:$0xff]  ;;  %v101_v48 = vld [vmem:[%s828_s1 + $0x118] sm:$0xff] }
  0x11   :  { %196 = vmatpush.msra.mxu1 %v91_v27  ;;  %141 = vmatpush.msra.mxu0 %v74_v29  ;;  %v86_v47 = vld [vmem:[%s828_s1 + $0xa0] sm:$0xff]  ;;  %v69_v49 = vld [vmem:[%s828_s1 + $0x18] sm:$0xff]  ;;  %v100_v52 = vld [vmem:[%s828_s1 + $0x110] sm:$0xff] }
  0x12   :  { %309 = vmatpush.msra.mxu3 %v122_v30  ;;  %254 = vmatpush.msra.mxu2 %v105_v32  ;;  %v117_v50 = vld [vmem:[%s828_s1 + $0x198] sm:$0xff]  ;;  %v68_v53 = vld [vmem:[%s828_s1 + $0x10] sm:$0xff]  ;;  %v99_v56 = vld [vmem:[%s828_s1 + $0x108] sm:$0xff] }
  0x13   :  { %197 = vmatpush.msra.mxu1 %v90_v31  ;;  %142 = vmatpush.msra.mxu0 %v73_v33  ;;  %v85_v51 = vld [vmem:[%s828_s1 + $0x98] sm:$0xff]  ;;  %v116_v54 = vld [vmem:[%s828_s1 + $0x190] sm:$0xff]  ;;  %v67_v57 = vld [vmem:[%s828_s1 + $0x8] sm:$0xff] }
  0x14   :  { %310 = vmatpush.msra.mxu3 %v121_v34  ;;  %255 = vmatpush.msra.mxu2 %v104_v36  ;;  %v84_v55 = vld [vmem:[%s828_s1 + $0x90] sm:$0xff]  ;;  %v115_v58 = vld [vmem:[%s828_s1 + $0x188] sm:$0xff]  ;;  %v98_v60 = vld [vmem:[%s828_s1 + $0x100] sm:$0xff] }
  0x15   :  { %198 = vmatpush.msra.mxu1 %v89_v35  ;;  %143 = vmatpush.msra.mxu0 %v72_v37  ;;  %v83_v59 = vld [vmem:[%s828_s1 + $0x88] sm:$0xff]  ;;  %v66_v61 = vld [vmem:[%s828_s1] sm:$0xff]  ;;  %v16_v62 = vld [vmem:[%s830_s0 + $0x10] sm:$0xff] }
  0x16   :  { %311 = vmatpush.msra.mxu3 %v120_v38  ;;  %256 = vmatpush.msra.mxu2 %v103_v40  ;;  %v114_v63 = vld [vmem:[%s828_s1 + $0x180] sm:$0xff]  ;;  %v17_v1 = vld [vmem:[%s830_s0 + $0x18] sm:$0xff]  ;;  %v15_v3 = vld [vmem:[%s830_s0 + $0x8] sm:$0xff] }
  0x17   :  { %199 = vmatpush.msra.mxu1 %v88_v39  ;;  %144 = vmatpush.msra.mxu0 %v71_v41  ;;  %v14_v0 = vld [vmem:[%s830_s0] sm:$0xff]  ;;  %v20_v4 = vld [vmem:[%s830_s0 + $0x30] sm:$0xff]  ;;  %v21_v6 = vld [vmem:[%s830_s0 + $0x38] sm:$0xff] }
  0x18   :  { %312 = vmatpush.msra.mxu3 %v119_v42  ;;  %257 = vmatpush.msra.mxu2 %v102_v44  ;;  %v82_v2 = vld [vmem:[%s828_s1 + $0x80] sm:$0xff]  ;;  %v19_v7 = vld [vmem:[%s830_s0 + $0x28] sm:$0xff]  ;;  %v24_v8 = vld [vmem:[%s830_s0 + $0x50] sm:$0xff] }
  0x19   :  { %200 = vmatpush.msra.mxu1 %v87_v43  ;;  %145 = vmatpush.msra.mxu0 %v70_v45  ;;  %v18_v5 = vld [vmem:[%s830_s0 + $0x20] sm:$0xff]  ;;  %v25_v10 = vld [vmem:[%s830_s0 + $0x58] sm:$0xff]  ;;  %v23_v11 = vld [vmem:[%s830_s0 + $0x48] sm:$0xff] }
  0x1a   :  { %313 = vmatpush.msra.mxu3 %v118_v46  ;;  %258 = vmatpush.msra.mxu2 %v101_v48  ;;  %v22_v9 = vld [vmem:[%s830_s0 + $0x40] sm:$0xff]  ;;  %v28_v12 = vld [vmem:[%s830_s0 + $0x70] sm:$0xff]  ;;  %v29_v14 = vld [vmem:[%s830_s0 + $0x78] sm:$0xff] }
  0x1b   :  { %201 = vmatpush.msra.mxu1 %v86_v47  ;;  %146 = vmatpush.msra.mxu0 %v69_v49  ;;  %v26_v13 = vld [vmem:[%s830_s0 + $0x60] sm:$0xff]  ;;  %v27_v15 = vld [vmem:[%s830_s0 + $0x68] sm:$0xff]  ;;  %v32_v16 = vld [vmem:[%s830_s0 + $0x90] sm:$0xff] }
  0x1c   :  { %314 = vmatpush.msra.mxu3 %v117_v50  ;;  %259 = vmatpush.msra.mxu2 %v100_v52  ;;  %v30_v17 = vld [vmem:[%s830_s0 + $0x80] sm:$0xff]  ;;  %v33_v18 = vld [vmem:[%s830_s0 + $0x98] sm:$0xff]  ;;  %v31_v19 = vld [vmem:[%s830_s0 + $0x88] sm:$0xff] }
  0x1d   :  { %202 = vmatpush.msra.mxu1 %v85_v51  ;;  %147 = vmatpush.msra.mxu0 %v68_v53  ;;  %v36_v20 = vld [vmem:[%s830_s0 + $0xb0] sm:$0xff]  ;;  %v34_v21 = vld [vmem:[%s830_s0 + $0xa0] sm:$0xff]  ;;  %v37_v22 = vld [vmem:[%s830_s0 + $0xb8] sm:$0xff] }
  0x1e   :  { %315 = vmatpush.msra.mxu3 %v116_v54  ;;  %260 = vmatpush.msra.mxu2 %v99_v56  ;;  %v35_v23 = vld [vmem:[%s830_s0 + $0xa8] sm:$0xff]  ;;  %v40_v24 = vld [vmem:[%s830_s0 + $0xd0] sm:$0xff]  ;;  %v38_v25 = vld [vmem:[%s830_s0 + $0xc0] sm:$0xff] }
  0x1f   :  { %203 = vmatpush.msra.mxu1 %v84_v55  ;;  %148 = vmatpush.msra.mxu0 %v67_v57  ;;  %v41_v26 = vld [vmem:[%s830_s0 + $0xd8] sm:$0xff]  ;;  %v39_v27 = vld [vmem:[%s830_s0 + $0xc8] sm:$0xff]  ;;  %v44_v28 = vld [vmem:[%s830_s0 + $0xf0] sm:$0xff] }
  0x20   :  { %316 = vmatpush.msra.mxu3 %v115_v58  ;;  %261 = vmatpush.msra.mxu2 %v98_v60  ;;  %v42_v29 = vld [vmem:[%s830_s0 + $0xe0] sm:$0xff]  ;;  %v45_v30 = vld [vmem:[%s830_s0 + $0xf8] sm:$0xff]  ;;  %v43_v31 = vld [vmem:[%s830_s0 + $0xe8] sm:$0xff] }
  0x21   :  { %204 = vmatpush.msra.mxu1 %v83_v59  ;;  %149 = vmatpush.msra.mxu0 %v66_v61  ;;  %v48_v32 = vld [vmem:[%s830_s0 + $0x110] sm:$0xff]  ;;  %v46_v33 = vld [vmem:[%s830_s0 + $0x100] sm:$0xff]  ;;  %v49_v34 = vld [vmem:[%s830_s0 + $0x118] sm:$0xff] }
  0x22   :  { %262 = vmatmul.f32.vlgmr.msra.gmra.mxu2 %v16_v62  ;;  %317 = vmatpush.msra.mxu3 %v114_v63  ;;  %v47_v35 = vld [vmem:[%s830_s0 + $0x108] sm:$0xff]  ;;  %v52_v36 = vld [vmem:[%s830_s0 + $0x130] sm:$0xff]  ;;  %v50_v37 = vld [vmem:[%s830_s0 + $0x120] sm:$0xff] }
  0x23   :  { %150 = vmatmul.f32.vlgmr.msra.gmra.mxu0 %v14_v0  ;;  %318 = vmatmul.f32.vlgmr.msra.gmra.mxu3 %v17_v1  ;;  %v53_v38 = vld [vmem:[%s830_s0 + $0x138] sm:$0xff]  ;;  %v51_v39 = vld [vmem:[%s830_s0 + $0x128] sm:$0xff]  ;;  %v56_v40 = vld [vmem:[%s830_s0 + $0x150] sm:$0xff] }
  0x24   :  { %205 = vmatpush.msra.mxu1 %v82_v2  ;;  %v54_v41 = vld [vmem:[%s830_s0 + $0x140] sm:$0xff]  ;;  %v57_v42 = vld [vmem:[%s830_s0 + $0x158] sm:$0xff]  ;;  %v55_v43 = vld [vmem:[%s830_s0 + $0x148] sm:$0xff] }
  0x25   :  { %206 = vmatmul.f32.vlgmr.msra.gmra.mxu1 %v15_v3  ;;  %v60_v44 = vld [vmem:[%s830_s0 + $0x170] sm:$0xff]  ;;  %v58_v45 = vld [vmem:[%s830_s0 + $0x160] sm:$0xff]  ;;  %v61_v46 = vld [vmem:[%s830_s0 + $0x178] sm:$0xff] }
  0x26   :  { %v59_v47 = vld [vmem:[%s830_s0 + $0x168] sm:$0xff]  ;;  %v64_v48 = vld [vmem:[%s830_s0 + $0x190] sm:$0x3]  ;;  %v62_v49 = vld [vmem:[%s830_s0 + $0x180] sm:$0x3] }
  0x27   :  { %v65_v50 = vld [vmem:[%s830_s0 + $0x198] sm:$0x3]  ;;  %v63_v51 = vld [vmem:[%s830_s0 + $0x188] sm:$0x3]  ;;  %v762_v52 = vld [vmem:[%s829_s2] ss:$0 sm:$0xff] }
  0x2a   :  { %265 = vmatmul.f32.gmra.mxu2 %v20_v4 }
  0x2b   :  { %153 = vmatmul.f32.gmra.mxu0 %v18_v5  ;;  %321 = vmatmul.f32.gmra.mxu3 %v21_v6 }
  0x2d   :  { %209 = vmatmul.f32.gmra.mxu1 %v19_v7 }
  0x32   :  { %268 = vmatmul.f32.gmra.mxu2 %v24_v8 }
  0x33   :  { %156 = vmatmul.f32.gmra.mxu0 %v22_v9  ;;  %324 = vmatmul.f32.gmra.mxu3 %v25_v10 }
  0x35   :  { %212 = vmatmul.f32.gmra.mxu1 %v23_v11 }
  0x3a   :  { %271 = vmatmul.f32.gmra.mxu2 %v28_v12 }
  0x3b   :  { %159 = vmatmul.f32.gmra.mxu0 %v26_v13  ;;  %327 = vmatmul.f32.gmra.mxu3 %v29_v14 }
  0x3d   :  { %215 = vmatmul.f32.gmra.mxu1 %v27_v15 }
  0x42   :  { %274 = vmatmul.f32.gmra.mxu2 %v32_v16 }
  0x43   :  { %162 = vmatmul.f32.gmra.mxu0 %v30_v17  ;;  %330 = vmatmul.f32.gmra.mxu3 %v33_v18 }
  0x45   :  { %218 = vmatmul.f32.gmra.mxu1 %v31_v19 }
  0x4a   :  { %277 = vmatmul.f32.gmra.mxu2 %v36_v20 }
  0x4b   :  { %165 = vmatmul.f32.gmra.mxu0 %v34_v21  ;;  %333 = vmatmul.f32.gmra.mxu3 %v37_v22 }
  0x4d   :  { %221 = vmatmul.f32.gmra.mxu1 %v35_v23 }
  0x52   :  { %280 = vmatmul.f32.gmra.mxu2 %v40_v24 }
  0x53   :  { %168 = vmatmul.f32.gmra.mxu0 %v38_v25  ;;  %336 = vmatmul.f32.gmra.mxu3 %v41_v26 }
  0x55   :  { %224 = vmatmul.f32.gmra.mxu1 %v39_v27 }
  0x5a   :  { %283 = vmatmul.f32.gmra.mxu2 %v44_v28 }
  0x5b   :  { %171 = vmatmul.f32.gmra.mxu0 %v42_v29  ;;  %339 = vmatmul.f32.gmra.mxu3 %v45_v30 }
  0x5d   :  { %227 = vmatmul.f32.gmra.mxu1 %v43_v31 }
  0x62   :  { %286 = vmatmul.f32.gmra.mxu2 %v48_v32 }
  0x63   :  { %174 = vmatmul.f32.gmra.mxu0 %v46_v33  ;;  %342 = vmatmul.f32.gmra.mxu3 %v49_v34 }
  0x65   :  { %230 = vmatmul.f32.gmra.mxu1 %v47_v35 }
  0x6a   :  { %289 = vmatmul.f32.gmra.mxu2 %v52_v36 }
  0x6b   :  { %177 = vmatmul.f32.gmra.mxu0 %v50_v37  ;;  %345 = vmatmul.f32.gmra.mxu3 %v53_v38 }
  0x6d   :  { %233 = vmatmul.f32.gmra.mxu1 %v51_v39 }
  0x72   :  { %292 = vmatmul.f32.gmra.mxu2 %v56_v40 }
  0x73   :  { %180 = vmatmul.f32.gmra.mxu0 %v54_v41  ;;  %348 = vmatmul.f32.gmra.mxu3 %v57_v42 }
  0x75   :  { %236 = vmatmul.f32.gmra.mxu1 %v55_v43 }
  0x7a   :  { %295 = vmatmul.f32.gmra.mxu2 %v60_v44 }
  0x7b   :  { %183 = vmatmul.f32.gmra.mxu0 %v58_v45  ;;  %351 = vmatmul.f32.gmra.mxu3 %v61_v46 }
  0x7d   :  { %239 = vmatmul.f32.gmra.mxu1 %v59_v47 }
  0x82   :  { %298 = vmatmul.f32.gmra.mxu2 %v64_v48 }
  0x83   :  { %186 = vmatmul.f32.gmra.mxu0 %v62_v49  ;;  %354 = vmatmul.f32.gmra.mxu3 %v65_v50 }
  0x85   :  { %242 = vmatmul.f32.gmra.mxu1 %v63_v51 }
  0xa0   :  { %v151_v53 = vpop.f32.mrf.mxu0 }
  0xa1   :  { %v152_v54 = vadd.f32 %v762_v52, %v151_v53 }
  0xa2   :  { %v207_v55 = vpop.f32.mrf.mxu1 }
  0xa3   :  { %v208_v56 = vadd.f32 %v207_v55, %v152_v54 }
  0xa5   :  { %v263_v57 = vpop.f32.mrf.mxu2 }
  0xa6   :  { %v264_v58 = vadd.f32 %v263_v57, %v208_v56  ;;  %v319_v59 = vpop.f32.mrf.mxu3 }
  0xa8   :  { %v320_v60 = vadd.f32 %v319_v59, %v264_v58  ;;  %v154_v61 = vpop.f32.mrf.mxu0 }
  0xa9   :  { %v155_v62 = vadd.f32 %v762_v52, %v154_v61 }
  0xaa   :  { %v358_v63 = vmax.f32 %v320_v60, 0.0  ;;  %v210_v0 = vpop.f32.mrf.mxu1 }
  0xab   :  { %v211_v1 = vadd.f32 %v210_v0, %v155_v62 }
  0xac   :  { %372 = vst.msk [vmem:[%s831_s3] sm:$0xff] %vm371_vm0, %v358_v63 }
  0xad   :  { %v266_v2 = vpop.f32.mrf.mxu2 }
  0xae   :  { %v267_v3 = vadd.f32 %v266_v2, %v211_v1  ;;  %v322_v4 = vpop.f32.mrf.mxu3 }
  0xb0   :  { %v323_v5 = vadd.f32 %v322_v4, %v267_v3  ;;  %v157_v6 = vpop.f32.mrf.mxu0 }
  0xb1   :  { %v158_v7 = vadd.f32 %v762_v52, %v157_v6 }
  0xb2   :  { %v359_v8 = vmax.f32 %v323_v5, 0.0  ;;  %v213_v9 = vpop.f32.mrf.mxu1 }
  0xb3   :  { %v214_v10 = vadd.f32 %v213_v9, %v158_v7 }
  0xb4   :  { %373 = vst.msk [vmem:[%s831_s3 + $0x8] sm:$0xff] %vm371_vm0, %v359_v8 }
  0xb5   :  { %v269_v11 = vpop.f32.mrf.mxu2 }
  0xb6   :  { %v270_v12 = vadd.f32 %v269_v11, %v214_v10  ;;  %v325_v13 = vpop.f32.mrf.mxu3 }
  0xb8   :  { %v326_v14 = vadd.f32 %v325_v13, %v270_v12  ;;  %v160_v15 = vpop.f32.mrf.mxu0 }
  0xb9   :  { %v161_v16 = vadd.f32 %v762_v52, %v160_v15 }
  0xba   :  { %v360_v17 = vmax.f32 %v326_v14, 0.0  ;;  %v216_v18 = vpop.f32.mrf.mxu1 }
  0xbb   :  { %v217_v19 = vadd.f32 %v216_v18, %v161_v16 }
  0xbc   :  { %374 = vst.msk [vmem:[%s831_s3 + $0x10] sm:$0xff] %vm371_vm0, %v360_v17 }
  0xbd   :  { %v272_v20 = vpop.f32.mrf.mxu2 }
  0xbe   :  { %v273_v21 = vadd.f32 %v272_v20, %v217_v19  ;;  %v328_v22 = vpop.f32.mrf.mxu3 }
  0xc0   :  { %v329_v23 = vadd.f32 %v328_v22, %v273_v21  ;;  %v163_v24 = vpop.f32.mrf.mxu0 }
  0xc1   :  { %v164_v25 = vadd.f32 %v762_v52, %v163_v24 }
  0xc2   :  { %v361_v26 = vmax.f32 %v329_v23, 0.0  ;;  %v219_v27 = vpop.f32.mrf.mxu1 }
  0xc3   :  { %v220_v28 = vadd.f32 %v219_v27, %v164_v25 }
  0xc4   :  { %375 = vst.msk [vmem:[%s831_s3 + $0x18] sm:$0xff] %vm371_vm0, %v361_v26 }
  0xc5   :  { %v275_v29 = vpop.f32.mrf.mxu2 }
  0xc6   :  { %v276_v30 = vadd.f32 %v275_v29, %v220_v28  ;;  %v331_v31 = vpop.f32.mrf.mxu3 }
  0xc8   :  { %v332_v32 = vadd.f32 %v331_v31, %v276_v30  ;;  %v166_v33 = vpop.f32.mrf.mxu0 }
  0xc9   :  { %v167_v34 = vadd.f32 %v762_v52, %v166_v33 }
  0xca   :  { %v362_v35 = vmax.f32 %v332_v32, 0.0  ;;  %v222_v36 = vpop.f32.mrf.mxu1 }
  0xcb   :  { %v223_v37 = vadd.f32 %v222_v36, %v167_v34 }
  0xcc   :  { %376 = vst.msk [vmem:[%s831_s3 + $0x20] sm:$0xff] %vm371_vm0, %v362_v35 }
  0xcd   :  { %v278_v38 = vpop.f32.mrf.mxu2 }
  0xce   :  { %v279_v39 = vadd.f32 %v278_v38, %v223_v37  ;;  %v334_v40 = vpop.f32.mrf.mxu3 }
  0xd0   :  { %v335_v41 = vadd.f32 %v334_v40, %v279_v39  ;;  %v169_v42 = vpop.f32.mrf.mxu0 }
  0xd1   :  { %v170_v43 = vadd.f32 %v762_v52, %v169_v42 }
  0xd2   :  { %v363_v44 = vmax.f32 %v335_v41, 0.0  ;;  %v225_v45 = vpop.f32.mrf.mxu1 }
  0xd3   :  { %v226_v46 = vadd.f32 %v225_v45, %v170_v43 }
  0xd4   :  { %377 = vst.msk [vmem:[%s831_s3 + $0x28] sm:$0xff] %vm371_vm0, %v363_v44 }
  0xd5   :  { %v281_v47 = vpop.f32.mrf.mxu2 }
  0xd6   :  { %v282_v48 = vadd.f32 %v281_v47, %v226_v46  ;;  %v337_v49 = vpop.f32.mrf.mxu3 }
  0xd8   :  { %v338_v50 = vadd.f32 %v337_v49, %v282_v48  ;;  %v172_v51 = vpop.f32.mrf.mxu0 }
  0xd9   :  { %v173_v53 = vadd.f32 %v762_v52, %v172_v51 }
  0xda   :  { %v364_v54 = vmax.f32 %v338_v50, 0.0  ;;  %v228_v55 = vpop.f32.mrf.mxu1 }
  0xdb   :  { %v229_v56 = vadd.f32 %v228_v55, %v173_v53 }
  0xdc   :  { %378 = vst.msk [vmem:[%s831_s3 + $0x30] sm:$0xff] %vm371_vm0, %v364_v54 }
  0xdd   :  { %v284_v57 = vpop.f32.mrf.mxu2 }
  0xde   :  { %v285_v58 = vadd.f32 %v284_v57, %v229_v56  ;;  %v340_v59 = vpop.f32.mrf.mxu3 }
  0xe0   :  { %v341_v60 = vadd.f32 %v340_v59, %v285_v58  ;;  %v175_v61 = vpop.f32.mrf.mxu0 }
  0xe1   :  { %v176_v62 = vadd.f32 %v762_v52, %v175_v61 }
  0xe2   :  { %v365_v63 = vmax.f32 %v341_v60, 0.0  ;;  %v231_v0 = vpop.f32.mrf.mxu1 }
  0xe3   :  { %v232_v1 = vadd.f32 %v231_v0, %v176_v62 }
  0xe4   :  { %379 = vst.msk [vmem:[%s831_s3 + $0x38] sm:$0xff] %vm371_vm0, %v365_v63 }
  0xe5   :  { %v287_v2 = vpop.f32.mrf.mxu2 }
  0xe6   :  { %v288_v3 = vadd.f32 %v287_v2, %v232_v1  ;;  %v343_v4 = vpop.f32.mrf.mxu3 }
  0xe8   :  { %v344_v5 = vadd.f32 %v343_v4, %v288_v3  ;;  %v178_v6 = vpop.f32.mrf.mxu0 }
  0xe9   :  { %v179_v7 = vadd.f32 %v762_v52, %v178_v6 }
  0xea   :  { %v366_v8 = vmax.f32 %v344_v5, 0.0  ;;  %v234_v9 = vpop.f32.mrf.mxu1 }
  0xeb   :  { %v235_v10 = vadd.f32 %v234_v9, %v179_v7 }
  0xec   :  { %380 = vst.msk [vmem:[%s831_s3 + $0x40] sm:$0xff] %vm371_vm0, %v366_v8 }
  0xed   :  { %v290_v11 = vpop.f32.mrf.mxu2 }
  0xee   :  { %v291_v12 = vadd.f32 %v290_v11, %v235_v10  ;;  %v346_v13 = vpop.f32.mrf.mxu3 }
  0xf0   :  { %v347_v14 = vadd.f32 %v346_v13, %v291_v12  ;;  %v181_v15 = vpop.f32.mrf.mxu0 }
  0xf1   :  { %v182_v16 = vadd.f32 %v762_v52, %v181_v15 }
  0xf2   :  { %v367_v17 = vmax.f32 %v347_v14, 0.0  ;;  %v237_v18 = vpop.f32.mrf.mxu1 }
  0xf3   :  { %v238_v19 = vadd.f32 %v237_v18, %v182_v16 }
  0xf4   :  { %381 = vst.msk [vmem:[%s831_s3 + $0x48] sm:$0xff] %vm371_vm0, %v367_v17 }
  0xf5   :  { %v293_v20 = vpop.f32.mrf.mxu2 }
  0xf6   :  { %v294_v21 = vadd.f32 %v293_v20, %v238_v19  ;;  %v349_v22 = vpop.f32.mrf.mxu3 }
  0xf8   :  { %v350_v23 = vadd.f32 %v349_v22, %v294_v21  ;;  %v184_v24 = vpop.f32.mrf.mxu0 }
  0xf9   :  { %v185_v25 = vadd.f32 %v762_v52, %v184_v24 }
  0xfa   :  { %v368_v26 = vmax.f32 %v350_v23, 0.0  ;;  %v240_v27 = vpop.f32.mrf.mxu1 }
  0xfb   :  { %v241_v28 = vadd.f32 %v240_v27, %v185_v25 }
  0xfc   :  { %382 = vst.msk [vmem:[%s831_s3 + $0x50] sm:$0xff] %vm371_vm0, %v368_v26 }
  0xfd   :  { %v296_v29 = vpop.f32.mrf.mxu2 }
  0xfe   :  { %v297_v30 = vadd.f32 %v296_v29, %v241_v28  ;;  %v352_v31 = vpop.f32.mrf.mxu3 }
 0x100   :  { %v353_v32 = vadd.f32 %v352_v31, %v297_v30  ;;  %v187_v33 = vpop.f32.mrf.mxu0 }
 0x101   :  { %v188_v34 = vadd.f32 %v762_v52, %v187_v33 }
 0x102   :  { %v369_v35 = vmax.f32 %v353_v32, 0.0  ;;  %v243_v36 = vpop.f32.mrf.mxu1 }
 0x103   :  { %v244_v37 = vadd.f32 %v243_v36, %v188_v34 }
 0x104   :  { %383 = vst.msk [vmem:[%s831_s3 + $0x58] sm:$0xff] %vm371_vm0, %v369_v35 }
 0x105   :  { %v299_v38 = vpop.f32.mrf.mxu2 }
 0x106   :  { %v300_v39 = vadd.f32 %v299_v38, %v244_v37  ;;  %v355_v40 = vpop.f32.mrf.mxu3 }
 0x108   :  { %v356_v41 = vadd.f32 %v355_v40, %v300_v39 }
 0x10a   :  { %v370_v42 = vmax.f32 %v356_v41, 0.0 }
 0x10c   :  { %385 = vst.msk [vmem:[%s831_s3 + $0x60] sm:$0x3] %vm384_vm1, %v370_v42 }

// kernel: tile.8
= control target key start
LH: loop header
LB: loop body
LE: loop exit
PB: predicated region body
PF: predicated region fallthrough
CT: control target
= control target key end

     0   :  { %s22_s0 = inlined_call_operand.vmem [shape: f32[5], index: 0, kind: input, shape index: {}]   ;;  %s23_s1 = inlined_call_operand.vmem [shape: f32[5,5], index: 1, kind: output, shape index: {}]  }
   0x1   :  { %v4_v0 = vld [vmem:[%s22_s0] ss:$0 sm:$0xff] }
   0x2   :  { %5 = vst [vmem:[%s23_s1] sm:$0xff] %v4_v0 }

// kernel: perception_forward.5
= control target key start
LH: loop header
LB: loop body
LE: loop exit
PB: predicated region body
PF: predicated region fallthrough
CT: control target
= control target key end

     0   :  { %s1235_s30 = smov 0   ;;  %s1931_s0 = inlined_call_operand.vmem [shape: f32[2,25,576], index: 0, kind: input, shape index: {}]   ;;  %s1932_s1 = inlined_call_operand.vmem [shape: f32[576,64], index: 1, kind: input, shape index: {}]   ;;  %s1933_s2 = inlined_call_operand.vmem [shape: f32[1,64], index: 2, kind: input, shape index: {}]   ;;  %s1934_s3 = inlined_call_operand.vmem [shape: f32[2,25], index: 3, kind: input, shape index: {}]   ;;  %s1935_s4 = inlined_call_operand.vmem [shape: f32[64,512], index: 4, kind: input, shape index: {}]   ;;  %s1936_s5 = inlined_call_operand.vmem [shape: f32[64,512], index: 5, kind: input, shape index: {}]   ;;  %s1937_s6 = inlined_call_operand.vmem [shape: f32[1,512], index: 6, kind: input, shape index: {}]   ;;  %s1938_s7 = inlined_call_operand.vmem [shape: f32[512,64], index: 7, kind: input, shape index: {}]   ;;  %s1939_s8 = inlined_call_operand.vmem [shape: f32[1,64], index: 8, kind: input, shape index: {}]   ;;  %s1940_s9 = inlined_call_operand.vmem [shape: f32[2,1,64], index: 9, kind: output, shape index: {}]  }
   0x1 LB: > { %s1133_s10 = sadd.s32 4294967295, %s1183_s30   ;;  %p1137_p0 = scmp.ge.s32.totalorder %s1183_s30, 1  ;;  %s1183_s30 = sphi %s1235_s30, %s19_s30  }
   0x2   : > { %p287_p1 = scmp.lt.s32.totalorder %s1183_s30, 3 }
   0x4   : > { %p288_p2 = pnand %p1137_p0, %p287_p1 }
   0x5   : > { %p1347_p3 = scmp.lt.s32.totalorder (!%p288_p2), %s1133_s10, 1 }
   0x6   : > { %291 = sbr.rel (%p288_p2) target bundleno = 689 (0x2b1), region = 56 }
   0xb   : > { %v364_v0 = vld [vmem:[%s1932_s1 + $0x78] sm:$0xff]  ;;  %v363_v2 = vld [vmem:[%s1932_s1 + $0x70] sm:$0xff]  ;;  %v362_v6 = vld [vmem:[%s1932_s1 + $0x68] sm:$0xff]  ;;  %s1943_s10 = smov (!%p1347_p3, %s1133_s10), 1  ;;  %vm425_vm0 = vcmask 523264   ;;  %vm586_vm1 = vcmask 516096  }
   0xc   : > { %v396_v1 = vld [vmem:[%s1932_s1 + $0x178] sm:$0xff]  ;;  %438 = vmatpush.msra.mxu0 %v364_v0  ;;  %v395_v4 = vld [vmem:[%s1932_s1 + $0x170] sm:$0xff]  ;;  %v394_v8 = vld [vmem:[%s1932_s1 + $0x168] sm:$0xff]  ;;  %s1157_s17 = smul.u32 160, %s1943_s10  ;;  %vm642_vm2 = vcmask 1040384   ;;  %vm638_vm3 = vcmask 203776  }
   0xd   : > { %496 = vmatpush.msra.mxu2 %v396_v1  ;;  %v380_v3 = vld [vmem:[%s1932_s1 + $0xf8] sm:$0xff]  ;;  %v379_v7 = vld [vmem:[%s1932_s1 + $0xf0] sm:$0xff]  ;;  %v378_v10 = vld [vmem:[%s1932_s1 + $0xe8] sm:$0xff] }
   0xe   : > { %v412_v5 = vld [vmem:[%s1932_s1 + $0x1f8] sm:$0xff]  ;;  %467 = vmatpush.msra.mxu1 %v380_v3  ;;  %439 = vmatpush.msra.mxu0 %v363_v2  ;;  %v411_v9 = vld [vmem:[%s1932_s1 + $0x1f0] sm:$0xff]  ;;  %v361_v11 = vld [vmem:[%s1932_s1 + $0x60] sm:$0xff]  ;;  %s1433_s18 = scalar_lea.vmem %s1931_s0, %s1157_s17 }
   0xf   : > { %525 = vmatpush.msra.mxu3 %v412_v5  ;;  %497 = vmatpush.msra.mxu2 %v395_v4  ;;  %v393_v12 = vld [vmem:[%s1932_s1 + $0x160] sm:$0xff]  ;;  %v410_v13 = vld [vmem:[%s1932_s1 + $0x1e8] sm:$0xff]  ;;  %v360_v16 = vld [vmem:[%s1932_s1 + $0x58] sm:$0xff] }
  0x10   : > { %468 = vmatpush.msra.mxu1 %v379_v7  ;;  %440 = vmatpush.msra.mxu0 %v362_v6  ;;  %v377_v14 = vld [vmem:[%s1932_s1 + $0xe0] sm:$0xff]  ;;  %v392_v17 = vld [vmem:[%s1932_s1 + $0x158] sm:$0xff]  ;;  %v359_v20 = vld [vmem:[%s1932_s1 + $0x50] sm:$0xff] }
  0x11   : > { %526 = vmatpush.msra.mxu3 %v411_v9  ;;  %498 = vmatpush.msra.mxu2 %v394_v8  ;;  %v409_v15 = vld [vmem:[%s1932_s1 + $0x1e0] sm:$0xff]  ;;  %v376_v18 = vld [vmem:[%s1932_s1 + $0xd8] sm:$0xff]  ;;  %v391_v21 = vld [vmem:[%s1932_s1 + $0x150] sm:$0xff] }
  0x12   : > { %469 = vmatpush.msra.mxu1 %v378_v10  ;;  %441 = vmatpush.msra.mxu0 %v361_v11  ;;  %v408_v19 = vld [vmem:[%s1932_s1 + $0x1d8] sm:$0xff]  ;;  %v375_v22 = vld [vmem:[%s1932_s1 + $0xd0] sm:$0xff]  ;;  %v358_v24 = vld [vmem:[%s1932_s1 + $0x48] sm:$0xff] }
  0x13   : > { %527 = vmatpush.msra.mxu3 %v410_v13  ;;  %499 = vmatpush.msra.mxu2 %v393_v12  ;;  %v407_v23 = vld [vmem:[%s1932_s1 + $0x1d0] sm:$0xff]  ;;  %v390_v25 = vld [vmem:[%s1932_s1 + $0x148] sm:$0xff]  ;;  %v357_v28 = vld [vmem:[%s1932_s1 + $0x40] sm:$0xff] }
  0x14   : > { %470 = vmatpush.msra.mxu1 %v377_v14  ;;  %442 = vmatpush.msra.mxu0 %v360_v16  ;;  %v374_v26 = vld [vmem:[%s1932_s1 + $0xc8] sm:$0xff]  ;;  %v389_v29 = vld [vmem:[%s1932_s1 + $0x140] sm:$0xff]  ;;  %v356_v32 = vld [vmem:[%s1932_s1 + $0x38] sm:$0xff] }
  0x15   : > { %528 = vmatpush.msra.mxu3 %v409_v15  ;;  %500 = vmatpush.msra.mxu2 %v392_v17  ;;  %v406_v27 = vld [vmem:[%s1932_s1 + $0x1c8] sm:$0xff]  ;;  %v373_v30 = vld [vmem:[%s1932_s1 + $0xc0] sm:$0xff]  ;;  %v388_v33 = vld [vmem:[%s1932_s1 + $0x138] sm:$0xff] }
  0x16   : > { %471 = vmatpush.msra.mxu1 %v376_v18  ;;  %443 = vmatpush.msra.mxu0 %v359_v20  ;;  %v405_v31 = vld [vmem:[%s1932_s1 + $0x1c0] sm:$0xff]  ;;  %v372_v34 = vld [vmem:[%s1932_s1 + $0xb8] sm:$0xff]  ;;  %v355_v36 = vld [vmem:[%s1932_s1 + $0x30] sm:$0xff] }
  0x17   : > { %529 = vmatpush.msra.mxu3 %v408_v19  ;;  %501 = vmatpush.msra.mxu2 %v391_v21  ;;  %v404_v35 = vld [vmem:[%s1932_s1 + $0x1b8] sm:$0xff]  ;;  %v387_v37 = vld [vmem:[%s1932_s1 + $0x130] sm:$0xff]  ;;  %v354_v40 = vld [vmem:[%s1932_s1 + $0x28] sm:$0xff] }
  0x18   : > { %472 = vmatpush.msra.mxu1 %v375_v22  ;;  %444 = vmatpush.msra.mxu0 %v358_v24  ;;  %v371_v38 = vld [vmem:[%s1932_s1 + $0xb0] sm:$0xff]  ;;  %v386_v41 = vld [vmem:[%s1932_s1 + $0x128] sm:$0xff]  ;;  %v353_v44 = vld [vmem:[%s1932_s1 + $0x20] sm:$0xff] }
  0x19   : > { %530 = vmatpush.msra.mxu3 %v407_v23  ;;  %502 = vmatpush.msra.mxu2 %v390_v25  ;;  %v403_v39 = vld [vmem:[%s1932_s1 + $0x1b0] sm:$0xff]  ;;  %v370_v42 = vld [vmem:[%s1932_s1 + $0xa8] sm:$0xff]  ;;  %v385_v45 = vld [vmem:[%s1932_s1 + $0x120] sm:$0xff] }
  0x1a   : > { %473 = vmatpush.msra.mxu1 %v374_v26  ;;  %445 = vmatpush.msra.mxu0 %v357_v28  ;;  %v402_v43 = vld [vmem:[%s1932_s1 + $0x1a8] sm:$0xff]  ;;  %v369_v46 = vld [vmem:[%s1932_s1 + $0xa0] sm:$0xff]  ;;  %v352_v48 = vld [vmem:[%s1932_s1 + $0x18] sm:$0xff] }
  0x1b   : > { %531 = vmatpush.msra.mxu3 %v406_v27  ;;  %503 = vmatpush.msra.mxu2 %v389_v29  ;;  %v401_v47 = vld [vmem:[%s1932_s1 + $0x1a0] sm:$0xff]  ;;  %v384_v49 = vld [vmem:[%s1932_s1 + $0x118] sm:$0xff]  ;;  %v351_v52 = vld [vmem:[%s1932_s1 + $0x10] sm:$0xff] }
  0x1c   : > { %474 = vmatpush.msra.mxu1 %v373_v30  ;;  %446 = vmatpush.msra.mxu0 %v356_v32  ;;  %v368_v50 = vld [vmem:[%s1932_s1 + $0x98] sm:$0xff]  ;;  %v383_v53 = vld [vmem:[%s1932_s1 + $0x110] sm:$0xff]  ;;  %v350_v56 = vld [vmem:[%s1932_s1 + $0x8] sm:$0xff] }
  0x1d   : > { %532 = vmatpush.msra.mxu3 %v405_v31  ;;  %504 = vmatpush.msra.mxu2 %v388_v33  ;;  %v400_v51 = vld [vmem:[%s1932_s1 + $0x198] sm:$0xff]  ;;  %v367_v54 = vld [vmem:[%s1932_s1 + $0x90] sm:$0xff]  ;;  %v382_v57 = vld [vmem:[%s1932_s1 + $0x108] sm:$0xff] }
  0x1e   : > { %475 = vmatpush.msra.mxu1 %v372_v34  ;;  %447 = vmatpush.msra.mxu0 %v355_v36  ;;  %v399_v55 = vld [vmem:[%s1932_s1 + $0x190] sm:$0xff]  ;;  %v366_v58 = vld [vmem:[%s1932_s1 + $0x88] sm:$0xff]  ;;  %v349_v60 = vld [vmem:[%s1932_s1] sm:$0xff] }
  0x1f   : > { %533 = vmatpush.msra.mxu3 %v404_v35  ;;  %505 = vmatpush.msra.mxu2 %v387_v37  ;;  %v398_v59 = vld [vmem:[%s1932_s1 + $0x188] sm:$0xff]  ;;  %v381_v61 = vld [vmem:[%s1932_s1 + $0x100] sm:$0xff]  ;;  %v331_v63 = vld [vmem:[%s1433_s18 + $0x10] sm:$0xff] }
  0x20   : > { %476 = vmatpush.msra.mxu1 %v371_v38  ;;  %448 = vmatpush.msra.mxu0 %v354_v40  ;;  %v329_v62 = vld [vmem:[%s1433_s18] sm:$0xff]  ;;  %v330_v2 = vld [vmem:[%s1433_s18 + $0x8] sm:$0xff]  ;;  %v332_v3 = vld [vmem:[%s1433_s18 + $0x18] sm:$0xff] }
  0x21   : > { %534 = vmatpush.msra.mxu3 %v403_v39  ;;  %506 = vmatpush.msra.mxu2 %v386_v41  ;;  %v365_v0 = vld [vmem:[%s1932_s1 + $0x80] sm:$0xff]  ;;  %v420_v4 = vld [vmem:[%s1932_s1 + $0x238] sm:$0xff]  ;;  %v419_v5 = vld [vmem:[%s1932_s1 + $0x230] sm:$0xff] }
  0x22   : > { %477 = vmatpush.msra.mxu1 %v370_v42  ;;  %449 = vmatpush.msra.mxu0 %v353_v44  ;;  %v397_v1 = vld [vmem:[%s1932_s1 + $0x180] sm:$0xff]  ;;  %v418_v6 = vld [vmem:[%s1932_s1 + $0x228] sm:$0xff]  ;;  %v336_v8 = vld [vmem:[%s1433_s18 + $0x38] sm:$0xff] }
  0x23   : > { %535 = vmatpush.msra.mxu3 %v402_v43  ;;  %507 = vmatpush.msra.mxu2 %v385_v45  ;;  %v334_v7 = vld [vmem:[%s1433_s18 + $0x28] sm:$0xff]  ;;  %v417_v9 = vld [vmem:[%s1932_s1 + $0x220] sm:$0xff]  ;;  %v335_v10 = vld [vmem:[%s1433_s18 + $0x30] sm:$0xff] }
  0x24   : > { %478 = vmatpush.msra.mxu1 %v369_v46  ;;  %450 = vmatpush.msra.mxu0 %v352_v48  ;;  %v337_v11 = vld [vmem:[%s1433_s18 + $0x40] sm:$0xff]  ;;  %v416_v12 = vld [vmem:[%s1932_s1 + $0x218] sm:$0xff]  ;;  %v415_v13 = vld [vmem:[%s1932_s1 + $0x210] sm:$0xff] }
  0x25   : > { %536 = vmatpush.msra.mxu3 %v401_v47  ;;  %508 = vmatpush.msra.mxu2 %v384_v49  ;;  %v414_v14 = vld [vmem:[%s1932_s1 + $0x208] sm:$0xff]  ;;  %v339_v15 = vld [vmem:[%s1433_s18 + $0x50] sm:$0xff]  ;;  %v341_v16 = vld [vmem:[%s1433_s18 + $0x60] sm:$0xff] }
  0x26   : > { %479 = vmatpush.msra.mxu1 %v368_v50  ;;  %451 = vmatpush.msra.mxu0 %v351_v52  ;;  %v413_v17 = vld [vmem:[%s1932_s1 + $0x200] sm:$0xff]  ;;  %v340_v18 = vld [vmem:[%s1433_s18 + $0x58] sm:$0xff]  ;;  %v342_v19 = vld [vmem:[%s1433_s18 + $0x68] sm:$0xff] }
  0x27   : > { %537 = vmatpush.msra.mxu3 %v400_v51  ;;  %509 = vmatpush.msra.mxu2 %v383_v53  ;;  %v344_v20 = vld [vmem:[%s1433_s18 + $0x78] sm:$0x1]  ;;  %v346_v21 = vld [vmem:[%s1433_s18 + $0x88] sm:$0x1]  ;;  %v345_v22 = vld [vmem:[%s1433_s18 + $0x80] sm:$0x1] }
  0x28   : > { %480 = vmatpush.msra.mxu1 %v367_v54  ;;  %452 = vmatpush.msra.mxu0 %v350_v56  ;;  %v347_v23 = vld [vmem:[%s1433_s18 + $0x90] sm:$0x1]  ;;  %v333_v24 = vld [vmem:[%s1433_s18 + $0x20] sm:$0xff]  ;;  %v338_v25 = vld [vmem:[%s1433_s18 + $0x48] sm:$0xff] }
  0x29   : > { %538 = vmatpush.msra.mxu3 %v399_v55  ;;  %510 = vmatpush.msra.mxu2 %v382_v57  ;;  %v343_v26 = vld [vmem:[%s1433_s18 + $0x70] sm:$0xff]  ;;  %v348_v27 = vld [vmem:[%s1433_s18 + $0x98] sm:$0x1]  ;;  %v1166_v41 = vld [vmem:[%s1933_s2] ss:$0 sm:$0xff]  ;;  %s328_s18 = scalar_lea.vmem %s1940_s9, %s1943_s10 }
  0x2a   : > { %481 = vmatpush.msra.mxu1 %v366_v58  ;;  %453 = vmatpush.msra.mxu0 %v349_v60 }
  0x2b   : > { %539 = vmatpush.msra.mxu3 %v398_v59  ;;  %511 = vmatpush.msra.mxu2 %v381_v61 }
  0x2c   : > { %454 = vmatmul.f32.vlgmr.msra.gmra.mxu0 %v329_v62  ;;  %512 = vmatmul.f32.vlgmr.msra.gmra.mxu2 %v331_v63 }
  0x2d   : > { %482 = vmatpush.msra.mxu1 %v365_v0  ;;  %540 = vmatpush.msra.mxu3 %v397_v1 }
  0x2e   : > { %483 = vmatmul.f32.vlgmr.msra.gmra.mxu1 %v330_v2  ;;  %541 = vmatmul.f32.vlgmr.msra.gmra.mxu3 %v332_v3 }
  0x2f   : > { %562 = vmatpush.msrb.mxu0 %v420_v4 }
  0x31   : > { %563 = vmatpush.msrb.mxu0 %v419_v5 }
  0x33   : > { %564 = vmatpush.msrb.mxu0 %v418_v6 }
  0x34   : > { %457 = vmatmul.f32.gmra.mxu0 %v334_v7  ;;  %515 = vmatmul.f32.gmra.mxu2 %v336_v8 }
  0x35   : > { %565 = vmatpush.msrb.mxu0 %v417_v9 }
  0x36   : > { %486 = vmatmul.f32.gmra.mxu1 %v335_v10  ;;  %544 = vmatmul.f32.gmra.mxu3 %v337_v11 }
  0x37   : > { %566 = vmatpush.msrb.mxu0 %v416_v12 }
  0x39   : > { %567 = vmatpush.msrb.mxu0 %v415_v13 }
  0x3b   : > { %568 = vmatpush.msrb.mxu0 %v414_v14 }
  0x3c   : > { %460 = vmatmul.f32.gmra.mxu0 %v339_v15  ;;  %518 = vmatmul.f32.gmra.mxu2 %v341_v16 }
  0x3d   : > { %569 = vmatpush.msrb.mxu0 %v413_v17 }
  0x3e   : > { %489 = vmatmul.f32.gmra.mxu1 %v340_v18  ;;  %547 = vmatmul.f32.gmra.mxu3 %v342_v19  ;;  %v752_v18 = vld [vmem:[%s1936_s5 + $0xe0] sm:$0xff] }
  0x3f   : > { %v748_v19 = vld [vmem:[%s1936_s5 + $0xc0] sm:$0xff]  ;;  %767 = vmatpush.msrb.mxu3 %v752_v18  ;;  %v722_v18 = vld [vmem:[%s1935_s4 + $0xf0] sm:$0xff] }
  0x41   : > { %768 = vmatpush.msrb.mxu3 %v748_v19  ;;  %v739_v19 = vld [vmem:[%s1936_s5 + $0x78] sm:$0xff] }
  0x44   : > { %463 = vmatmul.f32.gmra.mxu0 %v344_v20  ;;  %521 = vmatmul.f32.gmra.mxu2 %v346_v21 }
  0x46   : > { %492 = vmatmul.f32.gmra.mxu1 %v345_v22  ;;  %550 = vmatmul.f32.gmra.mxu3 %v347_v23 }
  0x4c   : > { %1139 = vmatmul.msk.f32.vlgmr.msrb.gmra.mxu0 %vm425_vm0, %v333_v24  ;;  %v744_v24 = vld [vmem:[%s1936_s5 + $0xa0] sm:$0xff] }
  0x4d   : > { %769 = vmatpush.msrb.mxu3 %v744_v24  ;;  %v714_v24 = vld [vmem:[%s1935_s4 + $0xb0] sm:$0xff] }
  0x54   : > { %1140 = vmatmul.msk.f32.gmra.mxu0 %vm425_vm0, %v338_v25  ;;  %v720_v25 = vld [vmem:[%s1935_s4 + $0xe0] sm:$0xff] }
  0x55   : > { %850 = vmatpush.msra.mxu0 %v720_v25  ;;  %v731_v25 = vld [vmem:[%s1936_s5 + $0x38] sm:$0xff] }
  0x5c   : > { %1141 = vmatmul.msk.f32.gmra.mxu0 %vm425_vm0, %v343_v26 }
  0x64   : > { %1142 = vmatmul.msk.f32.gmra.mxu0 %vm425_vm0, %v348_v27 }
  0xa9   : > { %v455_v28 = vpop.f32.mrf.mxu0 }
  0xaa   : > { %v456_v45 = vadd.f32 %v1166_v41, %v455_v28 }
  0xab   : > { %v484_v30 = vpop.f32.mrf.mxu1 }
  0xac   : > { %v485_v50 = vadd.f32 %v484_v30, %v456_v45  ;;  %v740_v30 = vld [vmem:[%s1936_s5 + $0x80] sm:$0xff] }
  0xad   : > { %770 = vmatpush.msrb.mxu3 %v740_v30  ;;  %v705_v30 = vld [vmem:[%s1935_s4 + $0x68] sm:$0xff] }
  0xaf   : > { %v513_v32 = vpop.f32.mrf.mxu2 }
  0xb0   : > { %v514_v55 = vadd.f32 %v513_v32, %v485_v50  ;;  %v736_v32 = vld [vmem:[%s1936_s5 + $0x60] sm:$0xff] }
  0xb1   : > { %v458_v29 = vpop.f32.mrf.mxu0  ;;  %v542_v33 = vpop.f32.mrf.mxu3  ;;  %771 = vmatpush.msrb.mxu3 %v736_v32  ;;  %v701_v32 = vld [vmem:[%s1935_s4 + $0x48] sm:$0xff] }
  0xb2   : > { %v459_v43 = vadd.f32 %v1166_v41, %v458_v29  ;;  %v543_v61 = vadd.f32 %v542_v33, %v514_v55  ;;  %v712_v33 = vld [vmem:[%s1935_s4 + $0xa0] sm:$0xff]  ;;  %v753_v55 = vld [vmem:[%s1936_s5 + $0xe8] sm:$0xff] }
  0xb3   : > { %v487_v35 = vpop.f32.mrf.mxu1 }
  0xb4   : > { %v488_v47 = vadd.f32 %v487_v35, %v459_v43  ;;  %v732_v35 = vld [vmem:[%s1936_s5 + $0x40] sm:$0xff] }
  0xb5   : > { %772 = vmatpush.msrb.mxu3 %v732_v35  ;;  %v698_v35 = vld [vmem:[%s1935_s4 + $0x30] sm:$0xff] }
  0xb7   : > { %v516_v36 = vpop.f32.mrf.mxu2 }
  0xb8   : > { %v517_v51 = vadd.f32 %v516_v36, %v488_v47  ;;  %v704_v36 = vld [vmem:[%s1935_s4 + $0x60] sm:$0xff] }
  0xb9   : > { %v461_v31 = vpop.f32.mrf.mxu0  ;;  %v545_v37 = vpop.f32.mrf.mxu3 }
  0xba   : > { %v462_v46 = vadd.f32 %v1166_v41, %v461_v31  ;;  %v546_v58 = vadd.f32 %v545_v37, %v517_v51  ;;  %v716_v31 = vld [vmem:[%s1935_s4 + $0xc0] sm:$0xff]  ;;  %v751_v51 = vld [vmem:[%s1936_s5 + $0xd8] sm:$0xff] }
  0xbb   : > { %v490_v39 = vpop.f32.mrf.mxu1  ;;  %851 = vmatpush.msra.mxu0 %v716_v31  ;;  %v728_v37 = vld [vmem:[%s1936_s5 + $0x20] sm:$0xff]  ;;  %v706_v31 = vld [vmem:[%s1935_s4 + $0x70] sm:$0xff] }
  0xbc   : > { %v491_v52 = vadd.f32 %v490_v39, %v462_v46  ;;  %773 = vmatpush.msrb.mxu3 %v728_v37  ;;  %v693_v37 = vld [vmem:[%s1935_s4 + $0x8] sm:$0xff] }
  0xbd   : > { %852 = vmatpush.msra.mxu0 %v712_v33  ;;  %v702_v33 = vld [vmem:[%s1935_s4 + $0x50] sm:$0xff] }
  0xbf   : > { %v519_v40 = vpop.f32.mrf.mxu2 }
  0xc0   : > { %v520_v56 = vadd.f32 %v519_v40, %v491_v52 }
  0xc1   : > { %v464_v34 = vpop.f32.mrf.mxu0  ;;  %v548_v44 = vpop.f32.mrf.mxu3 }
  0xc2   : > { %v465_v48 = vadd.f32 %v1166_v41, %v464_v34  ;;  %v549_v62 = vadd.f32 %v548_v44, %v520_v56  ;;  %v708_v34 = vld [vmem:[%s1935_s4 + $0x80] sm:$0xff]  ;;  %v754_v56 = vld [vmem:[%s1936_s5 + $0xf0] sm:$0xff] }
  0xc3   : > { %v493_v49 = vpop.f32.mrf.mxu1  ;;  %853 = vmatpush.msra.mxu0 %v708_v34  ;;  %v724_v44 = vld [vmem:[%s1936_s5] sm:$0xff]  ;;  %v697_v34 = vld [vmem:[%s1935_s4 + $0x28] sm:$0xff] }
  0xc4   : > { %v494_v57 = vadd.f32 %v493_v49, %v465_v48  ;;  %v755_v48 = vld [vmem:[%s1936_s5 + $0xf8] sm:$0xff]  ;;  %774 = vmatpush.msrb.mxu3 %v724_v44 }
  0xc5   : > { %854 = vmatpush.msra.mxu0 %v704_v36 }
  0xc6   : > { %827 = vmatpush.msra.mxu3 %v755_v48  ;;  %v952_v48 = vld [vmem:[%s1938_s7 + $0x60] sm:$0xff] }
  0xc7   : > { %v522_v53 = vpop.f32.mrf.mxu2 }
  0xc8   : > { %v523_v59 = vadd.f32 %v522_v53, %v494_v57  ;;  %v637_v53 = vld [vmem:[%s1934_s3] sm:$0x1]  ;;  %828 = vmatpush.msra.mxu3 %v751_v51  ;;  %v747_v57 = vld [vmem:[%s1936_s5 + $0xb8] sm:$0xff] }
  0xc9   : > { %v571_v38 = vpop.f32.mrf.mxu0  ;;  %v551_v60 = vpop.f32.mrf.mxu3 }
  0xca   : > { %v552_v0 = vadd.f32 %v551_v60, %v523_v59  ;;  %v572_v1 = vadd.f32 %v571_v38, %v543_v61  ;;  %v700_v38 = vld [vmem:[%s1935_s4 + $0x40] sm:$0xff]  ;;  %v750_v59 = vld [vmem:[%s1936_s5 + $0xd0] sm:$0xff]  ;;  %v745_v60 = vld [vmem:[%s1936_s5 + $0xa8] sm:$0xff]  ;;  %829 = vmatpush.msra.mxu3 %v747_v57 }
  0xcb   : > { %855 = vmatpush.msra.mxu0 %v700_v38  ;;  %v746_v61 = vld [vmem:[%s1936_s5 + $0xb0] sm:$0xff]  ;;  %v723_v57 = vld [vmem:[%s1935_s4 + $0xf8] sm:$0xff] }
  0xcc   : > { %v583_v6 = vsel %vm425_vm0, %v572_v1, -inf  ;;  %v694_v38 = vld [vmem:[%s1935_s4 + $0x10] sm:$0xff] }
  0xd1   : > { %v574_v42 = vpop.f32.mrf.mxu0 }
  0xd2   : > { %v575_v63 = vadd.f32 %v574_v42, %v546_v58  ;;  %v749_v58 = vld [vmem:[%s1936_s5 + $0xc8] sm:$0xff] }
  0xd4   : > { %v584_v4 = vsel %vm425_vm0, %v575_v63, -inf }
  0xd5   : > { %v588_v9 = vmax.f32 %v583_v6, %v584_v4  ;;  %v729_v4 = vld [vmem:[%s1936_s5 + $0x28] sm:$0xff] }
  0xd9   : > { %v577_v54 = vpop.f32.mrf.mxu0 }
  0xda   : > { %v578_v2 = vadd.f32 %v577_v54, %v549_v62  ;;  %v667_v54 = vld [vmem:[%s1934_s3 + $0x1] sm:$0x1]  ;;  %v741_v62 = vld [vmem:[%s1936_s5 + $0x88] sm:$0xff] }
  0xdc   : > { %v585_v7 = vsel %vm425_vm0, %v578_v2, -inf }
  0xe1   : > { %v580_v3 = vpop.f32.mrf.mxu0 }
  0xe2   : > { %v581_v5 = vadd.f32 %v580_v3, %v552_v0  ;;  %v737_v0 = vld [vmem:[%s1936_s5 + $0x68] sm:$0xff]  ;;  %v734_v3 = vld [vmem:[%s1936_s5 + $0x50] sm:$0xff] }
  0xe4   : > { %v587_v8 = vsel %vm586_vm1, %v581_v5, -inf }
  0xe5   : > { %v589_v10 = vmax.f32 %v585_v7, %v587_v8 }
  0xe7   : > { %v590_v11 = vmax.f32 %v588_v9, %v589_v10 }
  0xe9   : > { %v591_v12 = vrot.slane %v590_v11, 4 }
  0xeb   : > { %v592_v13 = vmax.f32 %v590_v11, %v591_v12  ;;  %v696_v11 = vld [vmem:[%s1935_s4 + $0x20] sm:$0xff] }
  0xec   : > { %856 = vmatpush.msra.mxu0 %v696_v11  ;;  %v948_v11 = vld [vmem:[%s1938_s7 + $0x40] sm:$0xff] }
  0xed   : > { %v593_v14 = vrot.slane %v592_v13, 2 }
  0xef   : > { %v594_v15 = vmax.f32 %v592_v13, %v593_v14  ;;  %v725_v13 = vld [vmem:[%s1936_s5 + $0x8] sm:$0xff]  ;;  %v726_v14 = vld [vmem:[%s1936_s5 + $0x10] sm:$0xff] }
  0xf1   : > { %v595_v16 = vrot.slane %v594_v15, 1 }
  0xf3   : > { %v596_v17 = vmax.f32 %v594_v15, %v595_v16  ;;  %v743_v15 = vld [vmem:[%s1936_s5 + $0x98] sm:$0xff]  ;;  %v692_v16 = vld [vmem:[%s1935_s4] sm:$0xff] }
  0xf4   : > { %830 = vmatpush.msra.mxu3 %v743_v15  ;;  %857 = vmatpush.msra.mxu0 %v692_v16  ;;  %v964_v15 = vld [vmem:[%s1938_s7 + $0xc0] sm:$0xff]  ;;  %v983_v16 = vld [vmem:[%s1938_s7 + $0x158] sm:$0xff] }
  0xf5   : > { %v597_v20 = vsub.f32 %v572_v1, %v596_v17  ;;  %v598_v21 = vsub.f32 %v575_v63, %v596_v17  ;;  %v599_v22 = vsub.f32 %v578_v2, %v596_v17  ;;  %v600_v23 = vsub.f32 %v581_v5, %v596_v17  ;;  %v742_v63 = vld [vmem:[%s1936_s5 + $0x90] sm:$0xff]  ;;  %v733_v2 = vld [vmem:[%s1936_s5 + $0x48] sm:$0xff] }
  0xf6   : > { %v738_v1 = vld [vmem:[%s1936_s5 + $0x70] sm:$0xff]  ;;  %v721_v17 = vld [vmem:[%s1935_s4 + $0xe8] sm:$0xff]  ;;  %831 = vmatpush.msra.mxu3 %v739_v19  ;;  %v963_v19 = vld [vmem:[%s1938_s7 + $0xb8] sm:$0xff] }
  0xf7   : > { %v601_v26 = vmul.f32 1.442695, %v597_v20  ;;  %v603_v27 = vmul.f32 1.442695, %v598_v21  ;;  %v605_v28 = vmul.f32 1.442695, %v599_v22 }
  0xf8   : > { %v607_v29 = vmul.f32 1.442695, %v600_v23  ;;  %v730_v5 = vld [vmem:[%s1936_s5 + $0x30] sm:$0xff]  ;;  %v717_v20 = vld [vmem:[%s1935_s4 + $0xc8] sm:$0xff]  ;;  %v735_v22 = vld [vmem:[%s1936_s5 + $0x58] sm:$0xff] }
  0xf9   : > { %1167 = vpow2.f32 %v601_v26  ;;  %v718_v21 = vld [vmem:[%s1935_s4 + $0xd0] sm:$0xff]  ;;  %v713_v23 = vld [vmem:[%s1935_s4 + $0xa8] sm:$0xff]  ;;  %832 = vmatpush.msra.mxu3 %v735_v22 }
  0xfa   : > { %1169 = vpow2.f32 %v603_v27  ;;  %v709_v26 = vld [vmem:[%s1935_s4 + $0x88] sm:$0xff]  ;;  %v710_v27 = vld [vmem:[%s1935_s4 + $0x90] sm:$0xff] }
  0xfb   : > { %1171 = vpow2.f32 %v605_v28  ;;  %833 = vmatpush.msra.mxu3 %v731_v25  ;;  %v727_v28 = vld [vmem:[%s1936_s5 + $0x18] sm:$0xff]  ;;  %v945_v22 = vld [vmem:[%s1938_s7 + $0x28] sm:$0xff] }
  0xfc   : > { %1173 = vpow2.f32 %v607_v29  ;;  %v1001_v25 = vld [vmem:[%s1938_s7 + $0x1e8] sm:$0xff] }
  0xfd   : > { %834 = vmatpush.msra.mxu3 %v727_v28  ;;  %v980_v28 = vld [vmem:[%s1938_s7 + $0x140] sm:$0xff] }
  0xff   : > { %v1168_v39 = vpop.eup %1167 }
 0x100   : > { %v1170_v40 = vpop.eup %1169  ;;  %v609_v41 = vsel %vm425_vm0, %v1168_v39, 0.0 }
 0x101   : > { %v1172_v42 = vpop.eup %1171  ;;  %v610_v43 = vsel %vm425_vm0, %v1170_v40, 0.0 }
 0x102   : > { %v1174_v45 = vpop.eup %1173  ;;  %v611_v46 = vadd.f32 %v610_v43, %v609_v41  ;;  %v612_v47 = vsel %vm425_vm0, %v1172_v42, 0.0  ;;  %v954_v43 = vld [vmem:[%s1938_s7 + $0x70] sm:$0xff] }
 0x103   : > { %1143 = vmatpush.msk.msrb.mxu1 %vm642_vm2, %v1174_v45  ;;  %1145 = vmatpush.msk.msrb.mxu2 %vm642_vm2, %v1174_v45  ;;  %v614_v50 = vsel %vm586_vm1, %v1174_v45, 0.0 }
 0x104   : > { %v613_v49 = vadd.f32 %v612_v47, %v611_v46  ;;  %v953_v46 = vld [vmem:[%s1938_s7 + $0x68] sm:$0xff] }
 0x105   : > { %659 = vmatpush.msrb.mxu1 %v1172_v42  ;;  %684 = vmatpush.msrb.mxu2 %v1172_v42  ;;  %v955_v42 = vld [vmem:[%s1938_s7 + $0x78] sm:$0xff] }
 0x106   : > { %v615_v52 = vadd.f32 %v614_v50, %v613_v49  ;;  %1005 = vmatpush.msrb.mxu0 %v955_v42  ;;  %v951_v50 = vld [vmem:[%s1938_s7 + $0x58] sm:$0xff]  ;;  %v940_v42 = vld [vmem:[%s1938_s7] sm:$0xff] }
 0x107   : > { %660 = vmatpush.msrb.mxu1 %v1170_v40  ;;  %685 = vmatpush.msrb.mxu2 %v1170_v40 }
 0x108   : > { %v616_v6 = vrot.slane %v615_v52, 4  ;;  %1006 = vmatpush.msrb.mxu0 %v954_v43  ;;  %v957_v43 = vld [vmem:[%s1938_s7 + $0x88] sm:$0xff] }
 0x109   : > { %661 = vmatpush.msrb.mxu1 %v1168_v39  ;;  %686 = vmatpush.msrb.mxu2 %v1168_v39 }
 0x10a   : > { %1144 = vmatmul.msk.f32.vlgmr.msrb.gmra.mxu1 %vm638_vm3, %v637_v53  ;;  %1146 = vmatmul.msk.f32.vlgmr.msrb.gmra.mxu2 %vm638_vm3, %v667_v54  ;;  %v617_v7 = vadd.f32 %v616_v6, %v615_v52  ;;  %v950_v54 = vld [vmem:[%s1938_s7 + $0x50] sm:$0xff]  ;;  %v699_v6 = vld [vmem:[%s1935_s4 + $0x38] sm:$0xff] }
 0x10b   : > { %787 = vmatpush.msra.mxu1 %v753_v55  ;;  %807 = vmatpush.msra.mxu2 %v754_v56 }
 0x10c   : > { %v618_v8 = vrot.slane %v617_v7, 2  ;;  %1007 = vmatpush.msrb.mxu0 %v953_v46  ;;  %v956_v46 = vld [vmem:[%s1938_s7 + $0x80] sm:$0xff] }
 0x10d   : > { %788 = vmatpush.msra.mxu1 %v749_v58  ;;  %808 = vmatpush.msra.mxu2 %v750_v59  ;;  %v971_v58 = vld [vmem:[%s1938_s7 + $0xf8] sm:$0xff] }
 0x10e   : > { %v619_v9 = vadd.f32 %v618_v8, %v617_v7  ;;  %1008 = vmatpush.msrb.mxu0 %v952_v48  ;;  %v987_v59 = vld [vmem:[%s1938_s7 + $0x178] sm:$0xff]  ;;  %v949_v8 = vld [vmem:[%s1938_s7 + $0x48] sm:$0xff] }
 0x10f   : > { %789 = vmatpush.msra.mxu1 %v745_v60  ;;  %809 = vmatpush.msra.mxu2 %v746_v61  ;;  %v719_v60 = vld [vmem:[%s1935_s4 + $0xd8] sm:$0xff]  ;;  %v970_v61 = vld [vmem:[%s1938_s7 + $0xf0] sm:$0xff] }
 0x110   : > { %v620_v10 = vrot.slane %v619_v9, 1  ;;  %1009 = vmatpush.msrb.mxu0 %v951_v50  ;;  %v695_v7 = vld [vmem:[%s1935_s4 + $0x18] sm:$0xff]  ;;  %v994_v50 = vld [vmem:[%s1938_s7 + $0x1b0] sm:$0xff] }
 0x111   : > { %790 = vmatpush.msra.mxu1 %v741_v62  ;;  %810 = vmatpush.msra.mxu2 %v742_v63  ;;  %v986_v62 = vld [vmem:[%s1938_s7 + $0x170] sm:$0xff]  ;;  %v715_v63 = vld [vmem:[%s1935_s4 + $0xb8] sm:$0xff] }
 0x112   : > { %v1614_v12 = vadd.f32 %v620_v10, %v619_v9  ;;  %1010 = vmatpush.msrb.mxu0 %v950_v54  ;;  %v966_v9 = vld [vmem:[%s1938_s7 + $0xd0] sm:$0xff]  ;;  %v985_v10 = vld [vmem:[%s1938_s7 + $0x168] sm:$0xff]  ;;  %v995_v48 = vld [vmem:[%s1938_s7 + $0x1b8] sm:$0xff] }
 0x113   : > { %791 = vmatpush.msra.mxu1 %v737_v0  ;;  %811 = vmatpush.msra.mxu2 %v738_v1  ;;  %v969_v0 = vld [vmem:[%s1938_s7 + $0xe8] sm:$0xff]  ;;  %v711_v1 = vld [vmem:[%s1935_s4 + $0x98] sm:$0xff]  ;;  %v992_v54 = vld [vmem:[%s1938_s7 + $0x1a0] sm:$0xff] }
 0x114   : > { %1175 = vrcp.f32 %v1614_v12  ;;  %v633_v44 = vand.u32 2147483648, %v1614_v12  ;;  %vm627_vm5 = vweird.f32 %v1614_v12  ;;  %v631_v45 = vand.u32 2147483647, %v1614_v12  ;;  %1011 = vmatpush.msrb.mxu0 %v949_v8 }
 0x115   : > { %792 = vmatpush.msra.mxu1 %v733_v2  ;;  %812 = vmatpush.msra.mxu2 %v734_v3  ;;  %v707_v2 = vld [vmem:[%s1935_s4 + $0x78] sm:$0xff]  ;;  %v968_v3 = vld [vmem:[%s1938_s7 + $0xe0] sm:$0xff] }
 0x116   : > { %v634_v49 = vor.u32 1.1754944e-38, %v633_v44  ;;  %vm632_vm7 = vcmp.eq.f32.partialorder %v631_v45, 8.507059e+37  ;;  %1012 = vmatpush.msrb.mxu0 %v948_v11  ;;  %v976_v44 = vld [vmem:[%s1938_s7 + $0x120] sm:$0xff] }
 0x117   : > { %793 = vmatpush.msra.mxu1 %v729_v4  ;;  %813 = vmatpush.msra.mxu2 %v730_v5  ;;  %v703_v4 = vld [vmem:[%s1935_s4 + $0x58] sm:$0xff]  ;;  %v996_v45 = vld [vmem:[%s1938_s7 + $0x1c0] sm:$0xff] }
 0x118   : > { %v967_v5 = vld [vmem:[%s1938_s7 + $0xd8] sm:$0xff] }
 0x119   : > { %794 = vmatpush.msra.mxu1 %v725_v13  ;;  %814 = vmatpush.msra.mxu2 %v726_v14  ;;  %v984_v13 = vld [vmem:[%s1938_s7 + $0x160] sm:$0xff]  ;;  %v947_v14 = vld [vmem:[%s1938_s7 + $0x38] sm:$0xff] }
 0x11a   : > { %v1176_v29 = vpop.eup %1175  ;;  %1013 = vmatpush.msrb.mxu0 %v947_v14 }
 0x11b   : > { %870 = vmatpush.msrb.mxu1 %v721_v17  ;;  %890 = vmatpush.msrb.mxu2 %v722_v18  ;;  %v623_v36 = vmul.f32 %v1176_v29, %v1614_v12  ;;  %vm628_vm4 = vweird.f32 %v1176_v29  ;;  %v965_v12 = vld [vmem:[%s1938_s7 + $0xc8] sm:$0xff]  ;;  %v1003_v17 = vld [vmem:[%s1938_s7 + $0x1f8] sm:$0xff]  ;;  %v946_v18 = vld [vmem:[%s1938_s7 + $0x30] sm:$0xff] }
 0x11c   : > { %vm629_vm6 = vmor %vm627_vm5, %vm628_vm4  ;;  %1014 = vmatpush.msrb.mxu0 %v946_v18 }
 0x11d   : > { %871 = vmatpush.msrb.mxu1 %v717_v20  ;;  %891 = vmatpush.msrb.mxu2 %v718_v21  ;;  %v624_v39 = vsub.f32 1.0, %v623_v36  ;;  %v982_v20 = vld [vmem:[%s1938_s7 + $0x150] sm:$0xff] }
 0x11e   : > { %v1002_v21 = vld [vmem:[%s1938_s7 + $0x1f0] sm:$0xff]  ;;  %1015 = vmatpush.msrb.mxu0 %v945_v22 }
 0x11f   : > { %872 = vmatpush.msrb.mxu1 %v713_v23  ;;  %892 = vmatpush.msrb.mxu2 %v714_v24  ;;  %v625_v40 = vmul.f32 %v1176_v29, %v624_v39  ;;  %v962_v23 = vld [vmem:[%s1938_s7 + $0xb0] sm:$0xff]  ;;  %v981_v24 = vld [vmem:[%s1938_s7 + $0x148] sm:$0xff] }
 0x120   : > { %v978_v36 = vld [vmem:[%s1938_s7 + $0x130] sm:$0xff] }
 0x121   : > { %873 = vmatpush.msrb.mxu1 %v709_v26  ;;  %893 = vmatpush.msrb.mxu2 %v710_v27  ;;  %v626_v41 = vadd.f32 %v1176_v29, %v625_v40  ;;  %v944_v26 = vld [vmem:[%s1938_s7 + $0x20] sm:$0xff]  ;;  %v961_v27 = vld [vmem:[%s1938_s7 + $0xa8] sm:$0xff]  ;;  %v958_v39 = vld [vmem:[%s1938_s7 + $0x90] sm:$0xff] }
 0x122   : > { %1016 = vmatpush.msrb.mxu0 %v944_v26  ;;  %v977_v40 = vld [vmem:[%s1938_s7 + $0x128] sm:$0xff] }
 0x123   : > { %874 = vmatpush.msrb.mxu1 %v705_v30  ;;  %894 = vmatpush.msrb.mxu2 %v706_v31  ;;  %v630_v47 = vsel %vm629_vm6, %v1176_v29, %v626_v41  ;;  %v1000_v29 = vld [vmem:[%s1938_s7 + $0x1e0] sm:$0xff]  ;;  %v943_v30 = vld [vmem:[%s1938_s7 + $0x18] sm:$0xff]  ;;  %v997_v41 = vld [vmem:[%s1938_s7 + $0x1c8] sm:$0xff] }
 0x124   : > { %v635_v51 = vsel %vm632_vm7, %v634_v49, %v630_v47  ;;  %v960_v31 = vld [vmem:[%s1938_s7 + $0xa0] sm:$0xff]  ;;  %1017 = vmatpush.msrb.mxu0 %v943_v30  ;;  %v975_v47 = vld [vmem:[%s1938_s7 + $0x118] sm:$0xff]  ;;  %v974_v49 = vld [vmem:[%s1938_s7 + $0x110] sm:$0xff] }
 0x125   : > { %875 = vmatpush.msrb.mxu1 %v701_v32  ;;  %895 = vmatpush.msrb.mxu2 %v702_v33  ;;  %v979_v32 = vld [vmem:[%s1938_s7 + $0x138] sm:$0xff] }
 0x126   : > { %v999_v33 = vld [vmem:[%s1938_s7 + $0x1d8] sm:$0xff] }
 0x127   : > { %876 = vmatpush.msrb.mxu1 %v697_v34  ;;  %896 = vmatpush.msrb.mxu2 %v698_v35  ;;  %v942_v34 = vld [vmem:[%s1938_s7 + $0x10] sm:$0xff]  ;;  %v959_v35 = vld [vmem:[%s1938_s7 + $0x98] sm:$0xff] }
 0x128   : > { %1018 = vmatpush.msrb.mxu0 %v942_v34 }
 0x129   : > { %877 = vmatpush.msrb.mxu1 %v693_v37  ;;  %897 = vmatpush.msrb.mxu2 %v694_v38  ;;  %v998_v37 = vld [vmem:[%s1938_s7 + $0x1d0] sm:$0xff]  ;;  %v941_v38 = vld [vmem:[%s1938_s7 + $0x8] sm:$0xff] }
 0x12a   : > { %1019 = vmatpush.msrb.mxu0 %v941_v38 }
 0x12c   : > { %1020 = vmatpush.msrb.mxu0 %v940_v42 }
 0x187   : > { %v663_v52 = vpop.f32.mrf.mxu1 }
 0x188   : > { %v666_v53 = vmul.f32 %v663_v52, %v635_v51  ;;  %v993_v52 = vld [vmem:[%s1938_s7 + $0x1a8] sm:$0xff] }
 0x18a   : > { %1151 = vmatmul.msk.f32.vlgmr.msra.gmra.mxu0 %vm425_vm0, %v666_v53 }
 0x18d   : > { %v688_v55 = vpop.f32.mrf.mxu2 }
 0x18e   : > { %v691_v56 = vmul.f32 %v688_v55, %v635_v51  ;;  %v973_v51 = vld [vmem:[%s1938_s7 + $0x108] sm:$0xff]  ;;  %v991_v55 = vld [vmem:[%s1938_s7 + $0x198] sm:$0xff] }
 0x190   : > { %1147 = vmatmul.msk.f32.vlgmr.msrb.gmra.mxu3 %vm425_vm0, %v691_v56  ;;  %1148 = vmatmul.msk.f32.vlgmr.msra.gmra.mxu1 %vm425_vm0, %v691_v56 }
 0x191   : > { %1149 = vmatmul.msk.f32.vlgmr.msra.gmra.mxu2 %vm425_vm0, %v691_v56  ;;  %910 = vmatpush.msrb.mxu3 %v723_v57  ;;  %v989_v57 = vld [vmem:[%s1938_s7 + $0x188] sm:$0xff] }
 0x192   : > { %1025 = vmatpush.msra.mxu1 %v971_v58  ;;  %1045 = vmatpush.msra.mxu2 %v987_v59  ;;  %v988_v58 = vld [vmem:[%s1938_s7 + $0x180] sm:$0xff] }
 0x193   : > { %911 = vmatpush.msrb.mxu3 %v719_v60  ;;  %v922_v60 = vld [vmem:[%s1937_s6] sm:$0xf] }
 0x194   : > { %1026 = vmatpush.msra.mxu1 %v970_v61  ;;  %1046 = vmatpush.msra.mxu2 %v986_v62  ;;  %v924_v61 = vperm.slane %v922_v60, 0 }
 0x195   : > { %912 = vmatpush.msrb.mxu3 %v715_v63 }
 0x196   : > { %1027 = vmatpush.msra.mxu1 %v969_v0  ;;  %1047 = vmatpush.msra.mxu2 %v985_v10  ;;  %v926_v10 = vperm.slane %v922_v60, 2 }
 0x197   : > { %913 = vmatpush.msrb.mxu3 %v711_v1 }
 0x198   : > { %1150 = vmatmul.msk.f32.vlgmr.msra.gmra.mxu3 %vm425_vm0, %v691_v56  ;;  %1152 = vmatmul.msk.f32.vlgmr.msrb.gmra.mxu1 %vm425_vm0, %v666_v53  ;;  %v990_v56 = vld [vmem:[%s1938_s7 + $0x190] sm:$0xff] }
 0x199   : > { %1153 = vmatmul.msk.f32.vlgmr.msrb.gmra.mxu2 %vm425_vm0, %v666_v53  ;;  %914 = vmatpush.msrb.mxu3 %v707_v2  ;;  %v925_v2 = vperm.slane %v922_v60, 1 }
 0x19a   : > { %1028 = vmatpush.msra.mxu1 %v968_v3  ;;  %1048 = vmatpush.msra.mxu2 %v984_v13 }
 0x19b   : > { %915 = vmatpush.msrb.mxu3 %v703_v4 }
 0x19c   : > { %1029 = vmatpush.msra.mxu1 %v967_v5  ;;  %1049 = vmatpush.msra.mxu2 %v983_v16 }
 0x19d   : > { %916 = vmatpush.msrb.mxu3 %v699_v6 }
 0x19e   : > { %1030 = vmatpush.msra.mxu1 %v966_v9  ;;  %1050 = vmatpush.msra.mxu2 %v982_v20  ;;  %v1004_v20 = vld [vmem:[%s1939_s8] sm:$0x1] }
 0x19f   : > { %917 = vmatpush.msrb.mxu3 %v695_v7 }
 0x1a0   : > { %1154 = vmatmul.msk.f32.vlgmr.msrb.gmra.mxu3 %vm425_vm0, %v666_v53  ;;  %1031 = vmatpush.msra.mxu1 %v965_v12  ;;  %v972_v53 = vld [vmem:[%s1938_s7 + $0x100] sm:$0xff] }
 0x1a1   : > { %1065 = vmatpush.msra.mxu3 %v1003_v17  ;;  %1051 = vmatpush.msra.mxu2 %v981_v24 }
 0x1a2   : > { %1032 = vmatpush.msra.mxu1 %v964_v15  ;;  %v927_v15 = vperm.slane %v922_v60, 3 }
 0x1a3   : > { %1066 = vmatpush.msra.mxu3 %v1002_v21  ;;  %1052 = vmatpush.msra.mxu2 %v980_v28 }
 0x1a4   : > { %1033 = vmatpush.msra.mxu1 %v963_v19 }
 0x1a5   : > { %1067 = vmatpush.msra.mxu3 %v1001_v25  ;;  %1053 = vmatpush.msra.mxu2 %v979_v32 }
 0x1a6   : > { %1034 = vmatpush.msra.mxu1 %v962_v23 }
 0x1a7   : > { %1068 = vmatpush.msra.mxu3 %v1000_v29  ;;  %1054 = vmatpush.msra.mxu2 %v978_v36 }
 0x1a8   : > { %1035 = vmatpush.msra.mxu1 %v961_v27 }
 0x1a9   : > { %1069 = vmatpush.msra.mxu3 %v999_v33  ;;  %1055 = vmatpush.msra.mxu2 %v977_v40 }
 0x1aa   : > { %1036 = vmatpush.msra.mxu1 %v960_v31 }
 0x1ab   : > { %1070 = vmatpush.msra.mxu3 %v998_v37  ;;  %1056 = vmatpush.msra.mxu2 %v976_v44 }
 0x1ac   : > { %1037 = vmatpush.msra.mxu1 %v959_v35 }
 0x1ad   : > { %1071 = vmatpush.msra.mxu3 %v997_v41  ;;  %1057 = vmatpush.msra.mxu2 %v975_v47 }
 0x1ae   : > { %1038 = vmatpush.msra.mxu1 %v958_v39 }
 0x1af   : > { %1072 = vmatpush.msra.mxu3 %v996_v45  ;;  %1058 = vmatpush.msra.mxu2 %v974_v49 }
 0x1b0   : > { %1039 = vmatpush.msra.mxu1 %v957_v43 }
 0x1b1   : > { %1073 = vmatpush.msra.mxu3 %v995_v48  ;;  %1059 = vmatpush.msra.mxu2 %v973_v51 }
 0x1b2   : > { %1040 = vmatpush.msra.mxu1 %v956_v46 }
 0x1b3   : > { %1074 = vmatpush.msra.mxu3 %v994_v50  ;;  %1060 = vmatpush.msra.mxu2 %v972_v53 }
 0x1b5   : > { %1075 = vmatpush.msra.mxu3 %v993_v52 }
 0x1b7   : > { %1076 = vmatpush.msra.mxu3 %v992_v54 }
 0x1b9   : > { %1077 = vmatpush.msra.mxu3 %v991_v55 }
 0x1bb   : > { %1078 = vmatpush.msra.mxu3 %v990_v56 }
 0x1bd   : > { %1079 = vmatpush.msra.mxu3 %v989_v57 }
 0x1bf   : > { %1080 = vmatpush.msra.mxu3 %v988_v58 }
 0x207   : > { %v859_v62 = vpop.f32.mrf.mxu0 }
 0x20d   : > { %v796_v59 = vpop.f32.mrf.mxu1 }
 0x213   : > { %v776_v63 = vpop.f32.mrf.mxu3 }
 0x214   : > { %v860_v0 = vadd.f32 %v859_v62, %v776_v63  ;;  %v816_v1 = vpop.f32.mrf.mxu2 }
 0x215   : > { %v879_v3 = vpop.f32.mrf.mxu1 }
 0x216   : > { %v932_v4 = vadd.f32 %v924_v61, %v860_v0  ;;  %v880_v5 = vadd.f32 %v879_v3, %v796_v59 }
 0x218   : > { %v936_v6 = vmax.f32 %v932_v4, 0.0  ;;  %v933_v7 = vadd.f32 %v925_v2, %v880_v5 }
 0x21a   : > { %v937_v8 = vmax.f32 %v933_v7, 0.0  ;;  %1021 = vmatmul.f32.vlgmr.msrb.gmra.mxu0 %v936_v6 }
 0x21b   : > { %v836_v9 = vpop.f32.mrf.mxu3 }
 0x21c   : > { %v899_v11 = vpop.f32.mrf.mxu2  ;;  %1041 = vmatmul.f32.vlgmr.msra.gmra.mxu1 %v937_v8 }
 0x21d   : > { %v900_v12 = vadd.f32 %v899_v11, %v816_v1 }
 0x21f   : > { %v934_v13 = vadd.f32 %v926_v10, %v900_v12 }
 0x221   : > { %v938_v14 = vmax.f32 %v934_v13, 0.0 }
 0x223   : > { %1061 = vmatmul.f32.vlgmr.msra.gmra.mxu2 %v938_v14  ;;  %v919_v16 = vpop.f32.mrf.mxu3 }
 0x224   : > { %v920_v17 = vadd.f32 %v919_v16, %v836_v9 }
 0x226   : > { %v935_v18 = vadd.f32 %v927_v15, %v920_v17 }
 0x228   : > { %v939_v19 = vmax.f32 %v935_v18, 0.0 }
 0x22a   : > { %1081 = vmatmul.f32.vlgmr.msra.gmra.mxu3 %v939_v19 }
 0x297   : > { %v1022_v21 = vpop.f32.mrf.mxu0 }
 0x298   : > { %v1023_v22 = vadd.f32 %v1022_v21, %v1004_v20 }
 0x299   : > { %v1042_v23 = vpop.f32.mrf.mxu1 }
 0x29a   : > { %v1043_v25 = vadd.f32 %v1042_v23, %v1023_v22 }
 0x2a6   : > { %v1062_v24 = vpop.f32.mrf.mxu2 }
 0x2a7   : > { %v1063_v26 = vadd.f32 %v1062_v24, %v1043_v25 }
 0x2ad   : > { %v1082_v27 = vpop.f32.mrf.mxu3 }
 0x2ae   : > { %v1083_v28 = vadd.f32 %v1082_v27, %v1063_v26 }
 0x2b0   : > { %1085 = vst.msk [vmem:[%s328_s18] sm:$0x1] %vm586_vm1, %v1083_v28 }
 0x2b1 PF: > { %s19_s30 = sadd.s32 1, %s1183_s30  }
 0x2b2   : > { %p16_p4 = scmp.ge.s32.totalorder %s19_s30, 4  }
 0x2b4   :  { %18 = sbr.rel (!%p16_p4) target bundleno = 1 (0x1), region = 86 }

</bundles_post_ra>
